<compile_context>
chip_gen: v5e
topology: v5e:2x2
jax: 0.10.0
libtpu: 0.0.40
codegen_flags: <defaults>
</compile_context>

<pallas_src>
from functools import partial

import jax
import jax.numpy as jnp
from jax.experimental import pallas as pl
from jax.experimental.pallas import tpu as pltpu


def decoder_layer_kernel(xt_ref, enct_ref,
                         wqkv_s_ref, bqkv_s_ref, wo_s_ref, bo_s_ref,
                         wq_e_ref, bq_e_ref, wkv_e_ref, bkv_e_ref,
                         wo_e_ref, bo_e_ref,
                         w1_ref, b1_ref, w2_ref, b2_ref,
                         g_ref, beta_ref,
                         out_ref, slf_attn_ref, enc_attn_ref,
                         *, n_head):
    f32 = jnp.float32
    cdt = wqkv_s_ref.dtype                       # MXU-operand dtype (bf16 by default)

    x_t = xt_ref[0]                              # (D, L)  feature-major decoder input
    enc_t = enct_ref[0]                          # (D, Le) feature-major encoder output
    D, L = x_t.shape
    H = n_head
    dh = D // H
    scale = 1.0 / (dh ** 0.5)

    # ---- hoist f32 bias / affine columns once (JAX does not CSE broadcasts) ----
    bqkv_s = bqkv_s_ref[...]
    bo_s = bo_s_ref[...]
    bq_e = bq_e_ref[...]
    bkv_e = bkv_e_ref[...]
    bo_e = bo_e_ref[...]
    b1 = b1_ref[...]
    b2 = b2_ref[...]
    g = g_ref[...]
    beta = beta_ref[...]

    def proj(w_ref, act_f32, bias_col):
        # y^T = W @ x^T : PyTorch (out,in) weight used as-is, bf16 operands, f32 accumulate.
        return jnp.dot(w_ref[...], act_f32.astype(cdt),
                       preferred_element_type=f32) + bias_col

    def heads(a_t):
        # (n*dh, Lx) -> (n, dh, Lx): major-dim split, no data movement.
        return a_t.reshape(-1, dh, a_t.shape[-1])

    def attention(q_t3, k_t3, v_t3):
        # q_t3: (H, dh, Lq) f32 (already scaled); k_t3, v_t3: (H, dh, Lk) f32.
        # One head-batched MXU contraction per matmul (no per-head lane slicing / concat);
        # the only relayout is a minor-2D swap on q (supported transpose form, XLU).
        q_h = jnp.swapaxes(q_t3, 1, 2)                                        # (H, Lq, dh)
        s = jnp.einsum('hqd,hdk->hqk', q_h.astype(cdt), k_t3.astype(cdt),
                       preferred_element_type=f32)                            # (H, Lq, Lk)
        s = s - jnp.max(s, axis=-1, keepdims=True)
        p = jnp.exp(s)
        inv = pl.reciprocal(jnp.sum(p, axis=-1, keepdims=True), approx=True)  # EUP
        p = p * inv
        attn_avg = jnp.sum(p, axis=0) * (1.0 / H)                             # (Lq, Lk)
        ctx_t3 = jnp.einsum('hdk,hqk->hdq', v_t3.astype(cdt), p.astype(cdt),
                            preferred_element_type=f32)                       # (H, dh, Lq)
        return ctx_t3.reshape(D, q_t3.shape[-1]), attn_avg

    # ---- sub-layer 1: (unmasked) self attention, packed QKV in one matmul ----
    qkv_t = proj(wqkv_s_ref, x_t, bqkv_s)            # (3D, L)
    q_t = qkv_t[0:D] * scale
    k_t = qkv_t[D:2 * D]
    v_t = qkv_t[2 * D:3 * D]
    ctx1_t, slf_attn = attention(heads(q_t), heads(k_t), heads(v_t))
    attn1_t = proj(wo_s_ref, ctx1_t, bo_s)           # (D, L)
    slf_attn_ref[0] = slf_attn.astype(slf_attn_ref.dtype)

    # ---- sub-layer 2: encoder-decoder attention ----
    q2_t = proj(wq_e_ref, attn1_t, bq_e) * scale     # (D, L)
    kv_t = proj(wkv_e_ref, enc_t, bkv_e)             # (2D, Le)
    k2_t = kv_t[0:D]
    v2_t = kv_t[D:2 * D]
    ctx2_t, enc_attn = attention(heads(q2_t), heads(k2_t), heads(v2_t))
    attn2_t = proj(wo_e_ref, ctx2_t, bo_e)           # (D, L)
    enc_attn_ref[0] = enc_attn.astype(enc_attn_ref.dtype)

    # ---- sub-layer 3: position-wise FFN + residual + LayerNorm(eps=1e-6) ----
    h1 = jnp.maximum(proj(w1_ref, attn2_t, b1), 0.0)      # (d_inner, L)
    h2 = proj(w2_ref, h1, b2)                             # (D, L)
    y = h2 + attn2_t                                      # dropout == identity (eval mode)
    mu = jnp.mean(y, axis=0, keepdims=True)               # LN over features (axis 0 here)
    var = jnp.mean((y - mu) * (y - mu), axis=0, keepdims=True)
    y = (y - mu) * jax.lax.rsqrt(var + 1e-6)              # rsqrt -> EUP
    out_ref[0] = (y * g + beta).astype(out_ref.dtype)


def decoder_layer(dec_input, enc_output, params, n_head, compute_dtype=jnp.bfloat16):
    B, L, D = dec_input.shape
    Be, Le, De = enc_output.shape
    assert Be == B and De == D and D % n_head == 0
    d_inner = params["w1"].shape[0]

    # --- wrapper-side layout plumbing (one-time XLA work) ---
    x_t = jnp.swapaxes(dec_input, 1, 2)      # (B, D, L)
    enc_t = jnp.swapaxes(enc_output, 1, 2)   # (B, D, Le)

    wcast = lambda a: a.astype(compute_dtype)            # weights -> bf16 (half the DMA bytes)
    col = lambda a: a.reshape(-1, 1).astype(jnp.float32)  # biases as f32 columns

    weights = [
        wcast(params["slf_wqkv"]),      col(params["slf_bqkv"]),
        wcast(params["slf_wo"]),        col(params["slf_bo"]),
        wcast(params["enc_wqkv"][:D]),  col(params["enc_bqkv"][:D]),   # cross-attn Q proj
        wcast(params["enc_wqkv"][D:]),  col(params["enc_bqkv"][D:]),   # cross-attn KV proj
        wcast(params["enc_wo"]),        col(params["enc_bo"]),
        wcast(params["w1"]),            col(params["b1"]),
        wcast(params["w2"]),            col(params["b2"]),
        col(params["ln_g"]),            col(params["ln_b"]),
    ]

    def const_spec(a):
        return pl.BlockSpec(a.shape, lambda b: (0,) * a.ndim)

    in_specs = [pl.BlockSpec((1, D, L), lambda b: (b, 0, 0)),
                pl.BlockSpec((1, D, Le), lambda b: (b, 0, 0))]
    in_specs += [const_spec(a) for a in weights]

    out_shape = (jax.ShapeDtypeStruct((B, D, L), dec_input.dtype),
                 jax.ShapeDtypeStruct((B, L, L), jnp.float32),
                 jax.ShapeDtypeStruct((B, L, Le), jnp.float32))
    out_specs = (pl.BlockSpec((1, D, L), lambda b: (b, 0, 0)),
                 pl.BlockSpec((1, L, L), lambda b: (b, 0, 0)),
                 pl.BlockSpec((1, L, Le), lambda b: (b, 0, 0)))

    # Raise the scoped-VMEM limit only when resident (double-buffered) weights + per-step
    # activations exceed the 32 MiB default.  (v5e/v6e: 128 MiB physical.  On v7x (64 MiB)
    # the right fix at very large model sizes is K-tiling the FFN weights instead.)
    weight_bytes = sum(int(a.size) * a.dtype.itemsize for a in weights)
    act_bytes = 4 * (6 * D * L + 2 * D * Le + d_inner * L
                     + 2 * n_head * L * max(L, Le) + L * (L + Le))
    needed = 2 * weight_bytes + 2 * act_bytes
    vmem_limit = int(min(needed + (8 << 20), 100 * 1024 * 1024)) if needed > (32 << 20) else None

    kernel = partial(decoder_layer_kernel, n_head=n_head)
    out_t, slf_attn, enc_attn = pl.pallas_call(
        kernel,
        grid=(B,),
        in_specs=in_specs,
        out_specs=out_specs,
        out_shape=out_shape,
        compiler_params=pltpu.CompilerParams(
            dimension_semantics=("parallel",),    # independent batch rows (both v7x TCs if B even)
            vmem_limit_bytes=vmem_limit,
        ),
    )(x_t, enc_t, *weights)

    return jnp.swapaxes(out_t, 1, 2), slf_attn, enc_attn


def decoder_layer_ref(dec_input, enc_output, params, n_head, compute_dtype=jnp.bfloat16):
    """Pure-JAX reference with the same precision policy (bf16 operands, f32 accumulate)."""
    f32 = jnp.float32
    cdt = compute_dtype
    B, L, D = dec_input.shape
    H = n_head
    dh = D // H
    scale = 1.0 / (dh ** 0.5)

    def linear(x, w, b):
        return jnp.dot(x.astype(cdt), w.astype(cdt).T, preferred_element_type=f32) + b

    def mha(q_in, kv_in, wqkv, bqkv, wo, bo):
        q = linear(q_in, wqkv[:D], bqkv[:D]) * scale
        k = linear(kv_in, wqkv[D:2 * D], bqkv[D:2 * D])
        v = linear(kv_in, wqkv[2 * D:], bqkv[2 * D:])
        Lq, Lk = q.shape[1], k.shape[1]
        q = q.reshape(B, Lq, H, dh)
        k = k.reshape(B, Lk, H, dh)
        v = v.reshape(B, Lk, H, dh)
        s = jnp.einsum('bqhd,bkhd->bhqk', q.astype(cdt), k.astype(cdt),
                       preferred_element_type=f32)
        p = jax.nn.softmax(s, axis=-1)
        ctx = jnp.einsum('bhqk,bkhd->bqhd', p.astype(cdt), v.astype(cdt),
                         preferred_element_type=f32).reshape(B, Lq, D)
        return linear(ctx, wo, bo), jnp.mean(p, axis=1)

    a1, slf = mha(dec_input, dec_input, params["slf_wqkv"], params["slf_bqkv"],
                  params["slf_wo"], params["slf_bo"])
    a2, enc = mha(a1, enc_output, params["enc_wqkv"], params["enc_bqkv"],
                  params["enc_wo"], params["enc_bo"])
    h1 = jax.nn.relu(linear(a2, params["w1"], params["b1"]))
    h2 = linear(h1, params["w2"], params["b2"])
    y = h2 + a2
    mu = jnp.mean(y, axis=-1, keepdims=True)
    var = jnp.mean((y - mu) ** 2, axis=-1, keepdims=True)
    y = (y - mu) * jax.lax.rsqrt(var + 1e-6)
    return y * params["ln_g"] + params["ln_b"], slf, enc


def init_params(key, d_model, d_inner):
    ks = jax.random.split(key, 12)
    s = 0.05
    n = lambda k, shape: s * jax.random.normal(k, shape, jnp.float32)
    return {
        "slf_wqkv": n(ks[0], (3 * d_model, d_model)),
        "slf_bqkv": n(ks[1], (3 * d_model,)),
        "slf_wo":   n(ks[2], (d_model, d_model)),
        "slf_bo":   n(ks[3], (d_model,)),
        "enc_wqkv": n(ks[4], (3 * d_model, d_model)),
        "enc_bqkv": n(ks[5], (3 * d_model,)),
        "enc_wo":   n(ks[6], (d_model, d_model)),
        "enc_bo":   n(ks[7], (d_model,)),
        "w1":       n(ks[8], (d_inner, d_model)),
        "b1":       n(ks[9], (d_inner,)),
        "w2":       n(ks[10], (d_model, d_inner)),
        "b2":       n(ks[11], (d_model,)),
        "ln_g":     jnp.ones((d_model,), jnp.float32),
        "ln_b":     jnp.zeros((d_model,), jnp.float32),
    }


if __name__ == "__main__":
    B, L, Le = 2, 8, 16
    d_model, d_inner, n_head = 32, 64, 4       # d_k = d_v = d_model (packed in_proj path)

    key = jax.random.PRNGKey(0)
    kx, ke, kp = jax.random.split(key, 3)
    dec_input = jax.random.normal(kx, (B, L, d_model), jnp.float32)
    enc_output = jax.random.normal(ke, (B, Le, d_model), jnp.float32)
    params = init_params(kp, d_model, d_inner)

    dec_out, slf_attn, enc_attn = decoder_layer(dec_input, enc_output, params, n_head)
    jax.block_until_ready((dec_out, slf_attn, enc_attn))

    assert dec_out.shape == (B, L, d_model)
    assert slf_attn.shape == (B, L, L)
    assert enc_attn.shape == (B, L, Le)
    # attention rows sum to 1 (approx reciprocal -> loose tolerance)
    assert bool(jnp.all(jnp.abs(jnp.sum(slf_attn, axis=-1) - 1.0) < 1e-2))
    assert bool(jnp.all(jnp.abs(jnp.sum(enc_attn, axis=-1) - 1.0) < 1e-2))

    ref_out, ref_slf, ref_enc = decoder_layer_ref(dec_input, enc_output, params, n_head)
    assert bool(jnp.allclose(slf_attn, ref_slf, atol=1e-2, rtol=1e-2))
    assert bool(jnp.allclose(enc_attn, ref_enc, atol=1e-2, rtol=1e-2))
    assert bool(jnp.allclose(dec_out, ref_out, atol=5e-2, rtol=5e-2))
    print("KERNEL_OK")
</pallas_src>

<mosaic_0001>
module attributes {stable_mosaic.version = 11 : i64} {
  func.func @decoder_layer_kernel(%arg0: i32, %arg1: memref<1x32x8xf32, #tpu.memory_space<vmem>>, %arg2: memref<1x32x16xf32, #tpu.memory_space<vmem>>, %arg3: memref<96x32xbf16, #tpu.memory_space<vmem>>, %arg4: memref<96x1xf32, #tpu.memory_space<vmem>>, %arg5: memref<32x32xbf16, #tpu.memory_space<vmem>>, %arg6: memref<32x1xf32, #tpu.memory_space<vmem>>, %arg7: memref<32x32xbf16, #tpu.memory_space<vmem>>, %arg8: memref<32x1xf32, #tpu.memory_space<vmem>>, %arg9: memref<64x32xbf16, #tpu.memory_space<vmem>>, %arg10: memref<64x1xf32, #tpu.memory_space<vmem>>, %arg11: memref<32x32xbf16, #tpu.memory_space<vmem>>, %arg12: memref<32x1xf32, #tpu.memory_space<vmem>>, %arg13: memref<64x32xbf16, #tpu.memory_space<vmem>>, %arg14: memref<64x1xf32, #tpu.memory_space<vmem>>, %arg15: memref<32x64xbf16, #tpu.memory_space<vmem>>, %arg16: memref<32x1xf32, #tpu.memory_space<vmem>>, %arg17: memref<32x1xf32, #tpu.memory_space<vmem>>, %arg18: memref<32x1xf32, #tpu.memory_space<vmem>>, %arg19: memref<1x32x8xf32, #tpu.memory_space<vmem>>, %arg20: memref<1x8x8xf32, #tpu.memory_space<vmem>>, %arg21: memref<1x8x16xf32, #tpu.memory_space<vmem>>) attributes {dimension_semantics = [#tpu.dimension_semantics<parallel>], iteration_bounds = array<i64: 2>, scalar_prefetch = 0 : i64, scratch_operands = 0 : i64, tpu.core_type = #tpu.core_type<tc>, window_params = [{transform_indices = @transform_0, window_bounds = array<i64: 1, 32, 8>}, {transform_indices = @transform_1, window_bounds = array<i64: 1, 32, 16>}, {pipeline_mode = #tpu.pipeline_mode<synchronous>, transform_indices = @transform_2, window_bounds = array<i64: 96, 32>}, {pipeline_mode = #tpu.pipeline_mode<synchronous>, transform_indices = @transform_3, window_bounds = array<i64: 96, 1>}, {pipeline_mode = #tpu.pipeline_mode<synchronous>, transform_indices = @transform_4, window_bounds = array<i64: 32, 32>}, {pipeline_mode = #tpu.pipeline_mode<synchronous>, transform_indices = @transform_5, window_bounds = array<i64: 32, 1>}, {pipeline_mode = #tpu.pipeline_mode<synchronous>, transform_indices = @transform_6, window_bounds = array<i64: 32, 32>}, {pipeline_mode = #tpu.pipeline_mode<synchronous>, transform_indices = @transform_7, window_bounds = array<i64: 32, 1>}, {pipeline_mode = #tpu.pipeline_mode<synchronous>, transform_indices = @transform_8, window_bounds = array<i64: 64, 32>}, {pipeline_mode = #tpu.pipeline_mode<synchronous>, transform_indices = @transform_9, window_bounds = array<i64: 64, 1>}, {pipeline_mode = #tpu.pipeline_mode<synchronous>, transform_indices = @transform_10, window_bounds = array<i64: 32, 32>}, {pipeline_mode = #tpu.pipeline_mode<synchronous>, transform_indices = @transform_11, window_bounds = array<i64: 32, 1>}, {pipeline_mode = #tpu.pipeline_mode<synchronous>, transform_indices = @transform_12, window_bounds = array<i64: 64, 32>}, {pipeline_mode = #tpu.pipeline_mode<synchronous>, transform_indices = @transform_13, window_bounds = array<i64: 64, 1>}, {pipeline_mode = #tpu.pipeline_mode<synchronous>, transform_indices = @transform_14, window_bounds = array<i64: 32, 64>}, {pipeline_mode = #tpu.pipeline_mode<synchronous>, transform_indices = @transform_15, window_bounds = array<i64: 32, 1>}, {pipeline_mode = #tpu.pipeline_mode<synchronous>, transform_indices = @transform_16, window_bounds = array<i64: 32, 1>}, {pipeline_mode = #tpu.pipeline_mode<synchronous>, transform_indices = @transform_17, window_bounds = array<i64: 32, 1>}, {transform_indices = @transform_18, window_bounds = array<i64: 1, 32, 8>}, {transform_indices = @transform_19, window_bounds = array<i64: 1, 8, 8>}, {transform_indices = @transform_20, window_bounds = array<i64: 1, 8, 16>}]} {
    %c0 = arith.constant 0 : index
    %c0_0 = arith.constant 0 : index
    %c0_1 = arith.constant 0 : index
    %0 = vector.load %arg1[%c0, %c0_0, %c0_1] : memref<1x32x8xf32, #tpu.memory_space<vmem>>, vector<1x32x8xf32>
    %1 = vector.shape_cast %0 : vector<1x32x8xf32> to vector<32x8xf32>
    %c0_2 = arith.constant 0 : index
    %c0_3 = arith.constant 0 : index
    %c0_4 = arith.constant 0 : index
    %2 = vector.load %arg2[%c0_2, %c0_3, %c0_4] : memref<1x32x16xf32, #tpu.memory_space<vmem>>, vector<1x32x16xf32>
    %3 = vector.shape_cast %2 : vector<1x32x16xf32> to vector<32x16xf32>
    %c0_5 = arith.constant 0 : index
    %c0_6 = arith.constant 0 : index
    %4 = vector.load %arg4[%c0_5, %c0_6] : memref<96x1xf32, #tpu.memory_space<vmem>>, vector<96x1xf32>
    %c0_7 = arith.constant 0 : index
    %c0_8 = arith.constant 0 : index
    %5 = vector.load %arg6[%c0_7, %c0_8] : memref<32x1xf32, #tpu.memory_space<vmem>>, vector<32x1xf32>
    %c0_9 = arith.constant 0 : index
    %c0_10 = arith.constant 0 : index
    %6 = vector.load %arg8[%c0_9, %c0_10] : memref<32x1xf32, #tpu.memory_space<vmem>>, vector<32x1xf32>
    %c0_11 = arith.constant 0 : index
    %c0_12 = arith.constant 0 : index
    %7 = vector.load %arg10[%c0_11, %c0_12] : memref<64x1xf32, #tpu.memory_space<vmem>>, vector<64x1xf32>
    %c0_13 = arith.constant 0 : index
    %c0_14 = arith.constant 0 : index
    %8 = vector.load %arg12[%c0_13, %c0_14] : memref<32x1xf32, #tpu.memory_space<vmem>>, vector<32x1xf32>
    %c0_15 = arith.constant 0 : index
    %c0_16 = arith.constant 0 : index
    %9 = vector.load %arg14[%c0_15, %c0_16] : memref<64x1xf32, #tpu.memory_space<vmem>>, vector<64x1xf32>
    %c0_17 = arith.constant 0 : index
    %c0_18 = arith.constant 0 : index
    %10 = vector.load %arg16[%c0_17, %c0_18] : memref<32x1xf32, #tpu.memory_space<vmem>>, vector<32x1xf32>
    %c0_19 = arith.constant 0 : index
    %c0_20 = arith.constant 0 : index
    %11 = vector.load %arg17[%c0_19, %c0_20] : memref<32x1xf32, #tpu.memory_space<vmem>>, vector<32x1xf32>
    %c0_21 = arith.constant 0 : index
    %c0_22 = arith.constant 0 : index
    %12 = vector.load %arg18[%c0_21, %c0_22] : memref<32x1xf32, #tpu.memory_space<vmem>>, vector<32x1xf32>
    %c0_23 = arith.constant 0 : index
    %c0_24 = arith.constant 0 : index
    %13 = vector.load %arg3[%c0_23, %c0_24] : memref<96x32xbf16, #tpu.memory_space<vmem>>, vector<96x32xbf16>
    %14 = arith.truncf %1 : vector<32x8xf32> to vector<32x8xbf16>
    %cst = arith.constant dense<0.000000e+00> : vector<96x8xf32>
    %15 = tpu.matmul %13, %14, %cst {dimension_numbers = #tpu.dot_dimension_numbers<[1], [0], [0], [1], [0, 0, 1, 1], [], []>} : vector<96x32xbf16>, vector<32x8xbf16>, vector<96x8xf32> -> vector<96x8xf32>
    %16 = vector.broadcast %4 : vector<96x1xf32> to vector<96x8xf32>
    %17 = arith.addf %15, %16 : vector<96x8xf32>
    %18 = vector.extract_strided_slice %17 {offsets = [0, 0], sizes = [32, 8], strides = [1, 1]} : vector<96x8xf32> to vector<32x8xf32>
    %cst_25 = arith.constant 0.353553385 : f32
    %19 = vector.broadcast %cst_25 : f32 to vector<32x8xf32>
    %20 = arith.mulf %18, %19 : vector<32x8xf32>
    %21 = vector.extract_strided_slice %17 {offsets = [32, 0], sizes = [32, 8], strides = [1, 1]} : vector<96x8xf32> to vector<32x8xf32>
    %22 = vector.extract_strided_slice %17 {offsets = [64, 0], sizes = [32, 8], strides = [1, 1]} : vector<96x8xf32> to vector<32x8xf32>
    %23 = vector.shape_cast %20 : vector<32x8xf32> to vector<4x8x8xf32>
    %24 = vector.shape_cast %21 : vector<32x8xf32> to vector<4x8x8xf32>
    %25 = vector.shape_cast %22 : vector<32x8xf32> to vector<4x8x8xf32>
    %26 = tpu.transpose %23, [0, 2, 1] : vector<4x8x8xf32> -> vector<4x8x8xf32>
    %27 = arith.truncf %26 : vector<4x8x8xf32> to vector<4x8x8xbf16>
    %28 = arith.truncf %24 : vector<4x8x8xf32> to vector<4x8x8xbf16>
    "tpu.trace_start"() <{level = 10 : i32, message = "hqd,hdk->hqk"}> : () -> ()
    %cst_26 = arith.constant dense<0.000000e+00> : vector<4x8x8xf32>
    %29 = tpu.matmul %27, %28, %cst_26 {dimension_numbers = #tpu.dot_dimension_numbers<[2], [1], [1], [2], [0, 0, 0, 1, 1, 2], [0], [0]>} : vector<4x8x8xbf16>, vector<4x8x8xbf16>, vector<4x8x8xf32> -> vector<4x8x8xf32>
    "tpu.trace_stop"() : () -> ()
    %cst_27 = arith.constant dense<0xFF800000> : vector<4x8xf32>
    %30 = vector.multi_reduction <maximumf>, %29, %cst_27 [2] : vector<4x8x8xf32> to vector<4x8xf32>
    %31 = vector.shape_cast %30 : vector<4x8xf32> to vector<4x8x1xf32>
    %32 = vector.broadcast %31 : vector<4x8x1xf32> to vector<4x8x8xf32>
    %33 = arith.subf %29, %32 : vector<4x8x8xf32>
    %34 = math.exp %33 : vector<4x8x8xf32>
    %cst_28 = arith.constant dense<0.000000e+00> : vector<4x8xf32>
    %35 = vector.multi_reduction <add>, %34, %cst_28 [2] : vector<4x8x8xf32> to vector<4x8xf32>
    %36 = vector.shape_cast %35 : vector<4x8xf32> to vector<4x8x1xf32>
    %37 = tpu.reciprocal %36 {approx = true} : vector<4x8x1xf32> -> vector<4x8x1xf32>
    %38 = vector.broadcast %37 : vector<4x8x1xf32> to vector<4x8x8xf32>
    %39 = arith.mulf %34, %38 : vector<4x8x8xf32>
    %cst_29 = arith.constant dense<0.000000e+00> : vector<8x8xf32>
    %40 = vector.multi_reduction <add>, %39, %cst_29 [0] : vector<4x8x8xf32> to vector<8x8xf32>
    %cst_30 = arith.constant 2.500000e-01 : f32
    %41 = vector.broadcast %cst_30 : f32 to vector<8x8xf32>
    %42 = arith.mulf %40, %41 : vector<8x8xf32>
    %43 = arith.truncf %25 : vector<4x8x8xf32> to vector<4x8x8xbf16>
    %44 = arith.truncf %39 : vector<4x8x8xf32> to vector<4x8x8xbf16>
    "tpu.trace_start"() <{level = 10 : i32, message = "hdk,hqk->hdq"}> : () -> ()
    %cst_31 = arith.constant dense<0.000000e+00> : vector<4x8x8xf32>
    %45 = tpu.matmul %43, %44, %cst_31 {dimension_numbers = #tpu.dot_dimension_numbers<[2], [2], [1], [1], [0, 0, 0, 1, 1, 1], [0], [0]>} : vector<4x8x8xbf16>, vector<4x8x8xbf16>, vector<4x8x8xf32> -> vector<4x8x8xf32>
    "tpu.trace_stop"() : () -> ()
    %46 = vector.shape_cast %45 : vector<4x8x8xf32> to vector<32x8xf32>
    %c0_32 = arith.constant 0 : index
    %c0_33 = arith.constant 0 : index
    %47 = vector.load %arg5[%c0_32, %c0_33] : memref<32x32xbf16, #tpu.memory_space<vmem>>, vector<32x32xbf16>
    %48 = arith.truncf %46 : vector<32x8xf32> to vector<32x8xbf16>
    %cst_34 = arith.constant dense<0.000000e+00> : vector<32x8xf32>
    %49 = tpu.matmul %47, %48, %cst_34 {dimension_numbers = #tpu.dot_dimension_numbers<[1], [0], [0], [1], [0, 0, 1, 1], [], []>} : vector<32x32xbf16>, vector<32x8xbf16>, vector<32x8xf32> -> vector<32x8xf32>
    %50 = vector.broadcast %5 : vector<32x1xf32> to vector<32x8xf32>
    %51 = arith.addf %49, %50 : vector<32x8xf32>
    %c0_35 = arith.constant 0 : index
    %c0_36 = arith.constant 0 : index
    %c0_37 = arith.constant 0 : index
    %52 = vector.load %arg20[%c0_35, %c0_36, %c0_37] : memref<1x8x8xf32, #tpu.memory_space<vmem>>, vector<1x8x8xf32>
    %53 = vector.shape_cast %52 : vector<1x8x8xf32> to vector<8x8xf32>
    %54 = vector.shape_cast %42 : vector<8x8xf32> to vector<1x8x8xf32>
    tpu.vector_store %arg20[%c0_35, %c0_36, %c0_37], %54 {strides = array<i32>} : memref<1x8x8xf32, #tpu.memory_space<vmem>>, vector<1x8x8xf32>,
    %c0_38 = arith.constant 0 : index
    %c0_39 = arith.constant 0 : index
    %55 = vector.load %arg7[%c0_38, %c0_39] : memref<32x32xbf16, #tpu.memory_space<vmem>>, vector<32x32xbf16>
    %56 = arith.truncf %51 : vector<32x8xf32> to vector<32x8xbf16>
    %cst_40 = arith.constant dense<0.000000e+00> : vector<32x8xf32>
    %57 = tpu.matmul %55, %56, %cst_40 {dimension_numbers = #tpu.dot_dimension_numbers<[1], [0], [0], [1], [0, 0, 1, 1], [], []>} : vector<32x32xbf16>, vector<32x8xbf16>, vector<32x8xf32> -> vector<32x8xf32>
    %58 = vector.broadcast %6 : vector<32x1xf32> to vector<32x8xf32>
    %59 = arith.addf %57, %58 : vector<32x8xf32>
    %cst_41 = arith.constant 0.353553385 : f32
    %60 = vector.broadcast %cst_41 : f32 to vector<32x8xf32>
    %61 = arith.mulf %59, %60 : vector<32x8xf32>
    %c0_42 = arith.constant 0 : index
    %c0_43 = arith.constant 0 : index
    %62 = vector.load %arg9[%c0_42, %c0_43] : memref<64x32xbf16, #tpu.memory_space<vmem>>, vector<64x32xbf16>
    %63 = arith.truncf %3 : vector<32x16xf32> to vector<32x16xbf16>
    %cst_44 = arith.constant dense<0.000000e+00> : vector<64x16xf32>
    %64 = tpu.matmul %62, %63, %cst_44 {dimension_numbers = #tpu.dot_dimension_numbers<[1], [0], [0], [1], [0, 0, 1, 1], [], []>} : vector<64x32xbf16>, vector<32x16xbf16>, vector<64x16xf32> -> vector<64x16xf32>
    %65 = vector.broadcast %7 : vector<64x1xf32> to vector<64x16xf32>
    %66 = arith.addf %64, %65 : vector<64x16xf32>
    %67 = vector.extract_strided_slice %66 {offsets = [0, 0], sizes = [32, 16], strides = [1, 1]} : vector<64x16xf32> to vector<32x16xf32>
    %68 = vector.extract_strided_slice %66 {offsets = [32, 0], sizes = [32, 16], strides = [1, 1]} : vector<64x16xf32> to vector<32x16xf32>
    %69 = vector.shape_cast %61 : vector<32x8xf32> to vector<4x8x8xf32>
    %70 = vector.shape_cast %67 : vector<32x16xf32> to vector<4x8x16xf32>
    %71 = vector.shape_cast %68 : vector<32x16xf32> to vector<4x8x16xf32>
    %72 = tpu.transpose %69, [0, 2, 1] : vector<4x8x8xf32> -> vector<4x8x8xf32>
    %73 = arith.truncf %72 : vector<4x8x8xf32> to vector<4x8x8xbf16>
    %74 = arith.truncf %70 : vector<4x8x16xf32> to vector<4x8x16xbf16>
    "tpu.trace_start"() <{level = 10 : i32, message = "hqd,hdk->hqk"}> : () -> ()
    %cst_45 = arith.constant dense<0.000000e+00> : vector<4x8x16xf32>
    %75 = tpu.matmul %73, %74, %cst_45 {dimension_numbers = #tpu.dot_dimension_numbers<[2], [1], [1], [2], [0, 0, 0, 1, 1, 2], [0], [0]>} : vector<4x8x8xbf16>, vector<4x8x16xbf16>, vector<4x8x16xf32> -> vector<4x8x16xf32>
    "tpu.trace_stop"() : () -> ()
    %cst_46 = arith.constant dense<0xFF800000> : vector<4x8xf32>
    %76 = vector.multi_reduction <maximumf>, %75, %cst_46 [2] : vector<4x8x16xf32> to vector<4x8xf32>
    %77 = vector.shape_cast %76 : vector<4x8xf32> to vector<4x8x1xf32>
    %78 = vector.broadcast %77 : vector<4x8x1xf32> to vector<4x8x16xf32>
    %79 = arith.subf %75, %78 : vector<4x8x16xf32>
    %80 = math.exp %79 : vector<4x8x16xf32>
    %cst_47 = arith.constant dense<0.000000e+00> : vector<4x8xf32>
    %81 = vector.multi_reduction <add>, %80, %cst_47 [2] : vector<4x8x16xf32> to vector<4x8xf32>
    %82 = vector.shape_cast %81 : vector<4x8xf32> to vector<4x8x1xf32>
    %83 = tpu.reciprocal %82 {approx = true} : vector<4x8x1xf32> -> vector<4x8x1xf32>
    %84 = vector.broadcast %83 : vector<4x8x1xf32> to vector<4x8x16xf32>
    %85 = arith.mulf %80, %84 : vector<4x8x16xf32>
    %cst_48 = arith.constant dense<0.000000e+00> : vector<8x16xf32>
    %86 = vector.multi_reduction <add>, %85, %cst_48 [0] : vector<4x8x16xf32> to vector<8x16xf32>
    %cst_49 = arith.constant 2.500000e-01 : f32
    %87 = vector.broadcast %cst_49 : f32 to vector<8x16xf32>
    %88 = arith.mulf %86, %87 : vector<8x16xf32>
    %89 = arith.truncf %71 : vector<4x8x16xf32> to vector<4x8x16xbf16>
    %90 = arith.truncf %85 : vector<4x8x16xf32> to vector<4x8x16xbf16>
    "tpu.trace_start"() <{level = 10 : i32, message = "hdk,hqk->hdq"}> : () -> ()
    %cst_50 = arith.constant dense<0.000000e+00> : vector<4x8x8xf32>
    %91 = tpu.matmul %89, %90, %cst_50 {dimension_numbers = #tpu.dot_dimension_numbers<[2], [2], [1], [1], [0, 0, 0, 1, 1, 1], [0], [0]>} : vector<4x8x16xbf16>, vector<4x8x16xbf16>, vector<4x8x8xf32> -> vector<4x8x8xf32>
    "tpu.trace_stop"() : () -> ()
    %92 = vector.shape_cast %91 : vector<4x8x8xf32> to vector<32x8xf32>
    %c0_51 = arith.constant 0 : index
    %c0_52 = arith.constant 0 : index
    %93 = vector.load %arg11[%c0_51, %c0_52] : memref<32x32xbf16, #tpu.memory_space<vmem>>, vector<32x32xbf16>
    %94 = arith.truncf %92 : vector<32x8xf32> to vector<32x8xbf16>
    %cst_53 = arith.constant dense<0.000000e+00> : vector<32x8xf32>
    %95 = tpu.matmul %93, %94, %cst_53 {dimension_numbers = #tpu.dot_dimension_numbers<[1], [0], [0], [1], [0, 0, 1, 1], [], []>} : vector<32x32xbf16>, vector<32x8xbf16>, vector<32x8xf32> -> vector<32x8xf32>
    %96 = vector.broadcast %8 : vector<32x1xf32> to vector<32x8xf32>
    %97 = arith.addf %95, %96 : vector<32x8xf32>
    %c0_54 = arith.constant 0 : index
    %c0_55 = arith.constant 0 : index
    %c0_56 = arith.constant 0 : index
    %98 = vector.load %arg21[%c0_54, %c0_55, %c0_56] : memref<1x8x16xf32, #tpu.memory_space<vmem>>, vector<1x8x16xf32>
    %99 = vector.shape_cast %98 : vector<1x8x16xf32> to vector<8x16xf32>
    %100 = vector.shape_cast %88 : vector<8x16xf32> to vector<1x8x16xf32>
    tpu.vector_store %arg21[%c0_54, %c0_55, %c0_56], %100 {strides = array<i32>} : memref<1x8x16xf32, #tpu.memory_space<vmem>>, vector<1x8x16xf32>,
    %c0_57 = arith.constant 0 : index
    %c0_58 = arith.constant 0 : index
    %101 = vector.load %arg13[%c0_57, %c0_58] : memref<64x32xbf16, #tpu.memory_space<vmem>>, vector<64x32xbf16>
    %102 = arith.truncf %97 : vector<32x8xf32> to vector<32x8xbf16>
    %cst_59 = arith.constant dense<0.000000e+00> : vector<64x8xf32>
    %103 = tpu.matmul %101, %102, %cst_59 {dimension_numbers = #tpu.dot_dimension_numbers<[1], [0], [0], [1], [0, 0, 1, 1], [], []>} : vector<64x32xbf16>, vector<32x8xbf16>, vector<64x8xf32> -> vector<64x8xf32>
    %104 = vector.broadcast %9 : vector<64x1xf32> to vector<64x8xf32>
    %105 = arith.addf %103, %104 : vector<64x8xf32>
    %cst_60 = arith.constant 0.000000e+00 : f32
    %106 = vector.broadcast %cst_60 : f32 to vector<64x8xf32>
    %107 = arith.maximumf %105, %106 : vector<64x8xf32>
    %c0_61 = arith.constant 0 : index
    %c0_62 = arith.constant 0 : index
    %108 = vector.load %arg15[%c0_61, %c0_62] : memref<32x64xbf16, #tpu.memory_space<vmem>>, vector<32x64xbf16>
    %109 = arith.truncf %107 : vector<64x8xf32> to vector<64x8xbf16>
    %cst_63 = arith.constant dense<0.000000e+00> : vector<32x8xf32>
    %110 = tpu.matmul %108, %109, %cst_63 {dimension_numbers = #tpu.dot_dimension_numbers<[1], [0], [0], [1], [0, 0, 1, 1], [], []>} : vector<32x64xbf16>, vector<64x8xbf16>, vector<32x8xf32> -> vector<32x8xf32>
    %111 = vector.broadcast %10 : vector<32x1xf32> to vector<32x8xf32>
    %112 = arith.addf %110, %111 : vector<32x8xf32>
    %113 = arith.addf %112, %97 : vector<32x8xf32>
    %cst_64 = arith.constant dense<0.000000e+00> : vector<8xf32>
    %114 = vector.multi_reduction <add>, %113, %cst_64 [0] : vector<32x8xf32> to vector<8xf32>
    %115 = vector.shape_cast %114 : vector<8xf32> to vector<1x8xf32>
    %cst_65 = arith.constant 3.200000e+01 : f32
    %116 = vector.broadcast %cst_65 : f32 to vector<1x8xf32>
    %117 = arith.divf %115, %116 : vector<1x8xf32>
    %118 = vector.broadcast %117 : vector<1x8xf32> to vector<32x8xf32>
    %119 = arith.subf %113, %118 : vector<32x8xf32>
    %120 = vector.broadcast %117 : vector<1x8xf32> to vector<32x8xf32>
    %121 = arith.subf %113, %120 : vector<32x8xf32>
    %122 = arith.mulf %119, %121 : vector<32x8xf32>
    %cst_66 = arith.constant dense<0.000000e+00> : vector<8xf32>
    %123 = vector.multi_reduction <add>, %122, %cst_66 [0] : vector<32x8xf32> to vector<8xf32>
    %124 = vector.shape_cast %123 : vector<8xf32> to vector<1x8xf32>
    %cst_67 = arith.constant 3.200000e+01 : f32
    %125 = vector.broadcast %cst_67 : f32 to vector<1x8xf32>
    %126 = arith.divf %124, %125 : vector<1x8xf32>
    %127 = vector.broadcast %117 : vector<1x8xf32> to vector<32x8xf32>
    %128 = arith.subf %113, %127 : vector<32x8xf32>
    %cst_68 = arith.constant 9.99999997E-7 : f32
    %129 = vector.broadcast %cst_68 : f32 to vector<1x8xf32>
    %130 = arith.addf %126, %129 : vector<1x8xf32>
    %131 = math.rsqrt %130 : vector<1x8xf32>
    %132 = vector.broadcast %131 : vector<1x8xf32> to vector<32x8xf32>
    %133 = arith.mulf %128, %132 : vector<32x8xf32>
    %134 = vector.broadcast %11 : vector<32x1xf32> to vector<32x8xf32>
    %135 = arith.mulf %133, %134 : vector<32x8xf32>
    %136 = vector.broadcast %12 : vector<32x1xf32> to vector<32x8xf32>
    %137 = arith.addf %135, %136 : vector<32x8xf32>
    %c0_69 = arith.constant 0 : index
    %c0_70 = arith.constant 0 : index
    %c0_71 = arith.constant 0 : index
    %138 = vector.load %arg19[%c0_69, %c0_70, %c0_71] : memref<1x32x8xf32, #tpu.memory_space<vmem>>, vector<1x32x8xf32>
    %139 = vector.shape_cast %138 : vector<1x32x8xf32> to vector<32x8xf32>
    %140 = vector.shape_cast %137 : vector<32x8xf32> to vector<1x32x8xf32>
    tpu.vector_store %arg19[%c0_69, %c0_70, %c0_71], %140 {strides = array<i32>} : memref<1x32x8xf32, #tpu.memory_space<vmem>>, vector<1x32x8xf32>,
    return
  }
  func.func @transform_0(%arg0: i32) -> (i32, i32, i32) {
    %c0_i32 = arith.constant 0 : i32
    %c0_i32_0 = arith.constant 0 : i32
    %c0_i32_1 = arith.constant 0 : i32
    return %arg0, %c0_i32, %c0_i32_0 : i32, i32, i32
  }
  func.func @transform_1(%arg0: i32) -> (i32, i32, i32) {
    %c0_i32 = arith.constant 0 : i32
    %c0_i32_0 = arith.constant 0 : i32
    %c0_i32_1 = arith.constant 0 : i32
    return %arg0, %c0_i32, %c0_i32_0 : i32, i32, i32
  }
  func.func @transform_2(%arg0: i32) -> (i32, i32) {
    %c0_i32 = arith.constant 0 : i32
    %c0_i32_0 = arith.constant 0 : i32
    %c0_i32_1 = arith.constant 0 : i32
    return %c0_i32, %c0_i32_0 : i32, i32
  }
  func.func @transform_3(%arg0: i32) -> (i32, i32) {
    %c0_i32 = arith.constant 0 : i32
    %c0_i32_0 = arith.constant 0 : i32
    %c0_i32_1 = arith.constant 0 : i32
    return %c0_i32, %c0_i32_0 : i32, i32
  }
  func.func @transform_4(%arg0: i32) -> (i32, i32) {
    %c0_i32 = arith.constant 0 : i32
    %c0_i32_0 = arith.constant 0 : i32
    %c0_i32_1 = arith.constant 0 : i32
    return %c0_i32, %c0_i32_0 : i32, i32
  }
  func.func @transform_5(%arg0: i32) -> (i32, i32) {
    %c0_i32 = arith.constant 0 : i32
    %c0_i32_0 = arith.constant 0 : i32
    %c0_i32_1 = arith.constant 0 : i32
    return %c0_i32, %c0_i32_0 : i32, i32
  }
  func.func @transform_6(%arg0: i32) -> (i32, i32) {
    %c0_i32 = arith.constant 0 : i32
    %c0_i32_0 = arith.constant 0 : i32
    %c0_i32_1 = arith.constant 0 : i32
    return %c0_i32, %c0_i32_0 : i32, i32
  }
  func.func @transform_7(%arg0: i32) -> (i32, i32) {
    %c0_i32 = arith.constant 0 : i32
    %c0_i32_0 = arith.constant 0 : i32
    %c0_i32_1 = arith.constant 0 : i32
    return %c0_i32, %c0_i32_0 : i32, i32
  }
  func.func @transform_8(%arg0: i32) -> (i32, i32) {
    %c0_i32 = arith.constant 0 : i32
    %c0_i32_0 = arith.constant 0 : i32
    %c0_i32_1 = arith.constant 0 : i32
    return %c0_i32, %c0_i32_0 : i32, i32
  }
  func.func @transform_9(%arg0: i32) -> (i32, i32) {
    %c0_i32 = arith.constant 0 : i32
    %c0_i32_0 = arith.constant 0 : i32
    %c0_i32_1 = arith.constant 0 : i32
    return %c0_i32, %c0_i32_0 : i32, i32
  }
  func.func @transform_10(%arg0: i32) -> (i32, i32) {
    %c0_i32 = arith.constant 0 : i32
    %c0_i32_0 = arith.constant 0 : i32
    %c0_i32_1 = arith.constant 0 : i32
    return %c0_i32, %c0_i32_0 : i32, i32
  }
  func.func @transform_11(%arg0: i32) -> (i32, i32) {
    %c0_i32 = arith.constant 0 : i32
    %c0_i32_0 = arith.constant 0 : i32
    %c0_i32_1 = arith.constant 0 : i32
    return %c0_i32, %c0_i32_0 : i32, i32
  }
  func.func @transform_12(%arg0: i32) -> (i32, i32) {
    %c0_i32 = arith.constant 0 : i32
    %c0_i32_0 = arith.constant 0 : i32
    %c0_i32_1 = arith.constant 0 : i32
    return %c0_i32, %c0_i32_0 : i32, i32
  }
  func.func @transform_13(%arg0: i32) -> (i32, i32) {
    %c0_i32 = arith.constant 0 : i32
    %c0_i32_0 = arith.constant 0 : i32
    %c0_i32_1 = arith.constant 0 : i32
    return %c0_i32, %c0_i32_0 : i32, i32
  }
  func.func @transform_14(%arg0: i32) -> (i32, i32) {
    %c0_i32 = arith.constant 0 : i32
    %c0_i32_0 = arith.constant 0 : i32
    %c0_i32_1 = arith.constant 0 : i32
    return %c0_i32, %c0_i32_0 : i32, i32
  }
  func.func @transform_15(%arg0: i32) -> (i32, i32) {
    %c0_i32 = arith.constant 0 : i32
    %c0_i32_0 = arith.constant 0 : i32
    %c0_i32_1 = arith.constant 0 : i32
    return %c0_i32, %c0_i32_0 : i32, i32
  }
  func.func @transform_16(%arg0: i32) -> (i32, i32) {
    %c0_i32 = arith.constant 0 : i32
    %c0_i32_0 = arith.constant 0 : i32
    %c0_i32_1 = arith.constant 0 : i32
    return %c0_i32, %c0_i32_0 : i32, i32
  }
  func.func @transform_17(%arg0: i32) -> (i32, i32) {
    %c0_i32 = arith.constant 0 : i32
    %c0_i32_0 = arith.constant 0 : i32
    %c0_i32_1 = arith.constant 0 : i32
    return %c0_i32, %c0_i32_0 : i32, i32
  }
  func.func @transform_18(%arg0: i32) -> (i32, i32, i32) {
    %c0_i32 = arith.constant 0 : i32
    %c0_i32_0 = arith.constant 0 : i32
    %c0_i32_1 = arith.constant 0 : i32
    return %arg0, %c0_i32, %c0_i32_0 : i32, i32, i32
  }
  func.func @transform_19(%arg0: i32) -> (i32, i32, i32) {
    %c0_i32 = arith.constant 0 : i32
    %c0_i32_0 = arith.constant 0 : i32
    %c0_i32_1 = arith.constant 0 : i32
    return %arg0, %c0_i32, %c0_i32_0 : i32, i32, i32
  }
  func.func @transform_20(%arg0: i32) -> (i32, i32, i32) {
    %c0_i32 = arith.constant 0 : i32
    %c0_i32_0 = arith.constant 0 : i32
    %c0_i32_1 = arith.constant 0 : i32
    return %arg0, %c0_i32, %c0_i32_0 : i32, i32, i32
  }
}

</mosaic_0001>

<bundles_post_ra>
// kernel: tpu_custom_call.1
= control target key start
LH: loop header
LB: loop body
LE: loop exit
PB: predicated region body
PF: predicated region fallthrough
CT: control target
= control target key end

     0   :  { %s3311_s0 = inlined_call_operand.vmem [shape: f32[2,32,8], index: 0, kind: input, shape index: {}]   ;;  %s3312_s1 = inlined_call_operand.vmem [shape: f32[2,32,16], index: 1, kind: input, shape index: {}]   ;;  %s3313_s2 = inlined_call_operand.vmem [shape: bf16[96,32], index: 2, kind: input, shape index: {}]   ;;  %s3314_s3 = inlined_call_operand.vmem [shape: f32[96,1], index: 3, kind: input, shape index: {}]   ;;  %s3315_s4 = inlined_call_operand.vmem [shape: bf16[32,32], index: 4, kind: input, shape index: {}]   ;;  %s3316_s5 = inlined_call_operand.vmem [shape: f32[32,1], index: 5, kind: input, shape index: {}]   ;;  %s3317_s6 = inlined_call_operand.vmem [shape: bf16[32,32], index: 6, kind: input, shape index: {}]   ;;  %s3318_s7 = inlined_call_operand.vmem [shape: f32[32,1], index: 7, kind: input, shape index: {}]   ;;  %s3319_s8 = inlined_call_operand.vmem [shape: bf16[64,32], index: 8, kind: input, shape index: {}]   ;;  %s3320_s9 = inlined_call_operand.vmem [shape: f32[64,1], index: 9, kind: input, shape index: {}]   ;;  %s3321_s10 = inlined_call_operand.vmem [shape: bf16[32,32], index: 10, kind: input, shape index: {}]   ;;  %s3322_s11 = inlined_call_operand.vmem [shape: f32[32,1], index: 11, kind: input, shape index: {}]   ;;  %s3323_s12 = inlined_call_operand.vmem [shape: bf16[64,32], index: 12, kind: input, shape index: {}]   ;;  %s3324_s13 = inlined_call_operand.vmem [shape: f32[64,1], index: 13, kind: input, shape index: {}]   ;;  %s3325_s14 = inlined_call_operand.vmem [shape: bf16[32,64], index: 14, kind: input, shape index: {}]   ;;  %s3326_s15 = inlined_call_operand.vmem [shape: f32[32,1], index: 15, kind: input, shape index: {}]   ;;  %s3327_s16 = inlined_call_operand.vmem [shape: f32[32,1], index: 16, kind: input, shape index: {}]   ;;  %s3328_s17 = inlined_call_operand.vmem [shape: f32[32,1], index: 17, kind: input, shape index: {}]   ;;  %s3329_s18 = inlined_call_operand.vmem [shape: f32[2,32,8], index: 18, kind: output, shape index: {0}]   ;;  %s3330_s19 = inlined_call_operand.hbm [shape: f32[2,8,8], index: 19, kind: output, shape index: {1}]   ;;  %s3331_s20 = inlined_call_operand.hbm [shape: f32[2,8,16], index: 20, kind: output, shape index: {2}]  }
   0x1   :  { %3343 = sst [smem:[#allocation14_spill]] %s3311_s0 }
   0x2   :  { %3344 = sst [smem:[#allocation15_spill]] %s3312_s1 }
   0x3   :  { %3345 = sst [smem:[#allocation16_spill]] %s3313_s2 }
   0x4   :  { %3346 = sst [smem:[#allocation17_spill]] %s3314_s3 }
   0x5   :  { %3347 = sst [smem:[#allocation18_spill]] %s3315_s4 }
   0x6   :  { %3348 = sst [smem:[#allocation19_spill]] %s3316_s5 }
   0x7   :  { %3349 = sst [smem:[#allocation20_spill]] %s3317_s6 }
   0x8   :  { %3350 = sst [smem:[#allocation21_spill]] %s3318_s7 }
   0x9   :  { %3351 = sst [smem:[#allocation22_spill]] %s3319_s8 }
   0xa   :  { %3352 = sst [smem:[#allocation23_spill]] %s3320_s9 }
   0xb   :  { %3353 = sst [smem:[#allocation24_spill]] %s3321_s10 }
   0xc   :  { %3354 = sst [smem:[#allocation25_spill]] %s3322_s11 }
   0xd   :  { %3355 = sst [smem:[#allocation26_spill]] %s3323_s12 }
   0xe   :  { %26 = vsyncpa [#allocation3], 0 }
   0xf   :  { %28 = vsyncpa [#allocation3 + $0x1], 0 }
  0x10   :  { %29 = vsyncpa [#allocation5], 0 }
  0x11   :  { %31 = vsyncpa [#allocation5 + $0x1], 0  ;;  %s2847_s1 = smov 0   ;;  %s2849_s22 = smov 0  }
  0x12   :  { %s2851_s23 = smov 0   ;;  %s2853_s24 = smov 0  }
  0x13 LB: > { %3356 = sst [smem:[#allocation8_spill]] %s2726_s1  ;;  %s2868_s2 = sadd.s32 4294967295, %s2738_s24   ;;  %s2738_s24 = sphi %s2853_s24, %s3381_s24   ;;  %s2734_s23 = sphi %s2851_s23, %s3383_s23   ;;  %s2730_s22 = sphi %s2849_s22, %s3385_s22   ;;  %s2726_s1 = sphi %s2847_s1, %s3384_s1  }
  0x14   : > { %3357 = sst [smem:[#allocation9_spill]] %s2734_s23  ;;  %s2366_s25 = sadd.s32 4294967294, %s2738_s24  }
  0x15   : > { %3358 = sst [smem:[#allocation10_spill]] %s2738_s24  ;;  %s2872_s3 = sadd.s32 1, %s2738_s24  }
  0x16   : > { %3359 = sst [smem:[#allocation11_spill]] %s2872_s3  ;;  %s458_s26 = sadd.s32 1, %s2734_s23 }
  0x17   : > { %s455_s27 = ssub.s32 %s2738_s24, %s2872_s3  ;;  %p468_p0 = scmp.ne.s32.totalorder %s2734_s23, %s2730_s22 }
  0x18   : > { %p456_p1 = scmp.eq.s32.totalorder %s455_s27, 0  ;;  %p469_p2 = scmp.eq.s32.totalorder %s2868_s2, 1 }
  0x19   : > { %p474_p3 = scmp.ne.s32.totalorder %s2730_s22, %s2726_s1  ;;  %p475_p4 = scmp.eq.s32.totalorder %s2366_s25, 1 }
  0x1a   : > { %s2883_s28 = scalar_select %p456_p1, %s2734_s23, %s458_s26  }
  0x1b   : > { %p2885_p5 = por %p469_p2, %p468_p0  ;;  %p2889_p6 = por %p475_p4, %p474_p3 }
  0x1c   : > { %3360 = sst [smem:[#allocation12_spill]] %s2883_s28  ;;  %p2369_p7 = scmp.ge.s32.totalorder %s2738_s24, 1 }
  0x1d   : > { %s3362_s29 = scalar_select %p2889_p6, 1, 0 }
  0x1e   : > { %p583_p8 = scmp.lt.s32.totalorder %s2738_s24, 3 }
  0x1f   : > { %3363 = sst [smem:[#allocation13_spill]] %s3362_s29 }
  0x20   : > { %p584_p9 = pnand %p2369_p7, %p583_p8 }
  0x21   : > { %p656_p10 = scmp.lt.s32.totalorder (!%p584_p9), %s2868_s2, 1  ;;  %s3364_s21 = sld [smem:[#allocation17_spill]] (!%p584_p9) }
  0x22   : > { %587 = sbr.rel (%p584_p9) target bundleno = 2554 (0x9fa), region = 92  ;;  %s3365_s29 = sld [smem:[#allocation14_spill]] (!%p584_p9) }
  0x23   : > { %s3367_s5 = sld [smem:[#allocation19_spill]] (!%p584_p9)  ;;  %s3031_s23 = sand.u32 (!%p584_p9), 1, %s2730_s22  }
  0x24   : > { %s3368_s7 = sld [smem:[#allocation21_spill]] (!%p584_p9)  ;;  %s3342_s3 = sshll.u32 (!%p584_p9), %s3031_s23, 3 }
  0x25   : > { %s3369_s9 = sld [smem:[#allocation23_spill]] (!%p584_p9)  ;;  %s2506_s25 = sshll.u32 (!%p584_p9), %s2868_s2, 3 }
  0x26   : > { %s3370_s24 = sld [smem:[#allocation15_spill]] (!%p584_p9)  ;;  %s2664_s0 = scalar_lea.hbm (!%p584_p9), %s3330_s19, 16 }
  0x27   : > { %v684_v0 = vld [vmem:[%s3364_s21 + $0x20] sm:$0xff]  ;;  %v2740_v2 = vmov 0   ;;  %s657_s27 = scalar_select %p656_p10, %s2868_s2, 1  ;;  %v682_v8 = vld [vmem:[%s3364_s21 + $0x10] sm:$0xff]  ;;  %v681_v9 = vld [vmem:[%s3364_s21 + $0x8] sm:$0xff]  ;;  %vm836_vm0 = vcmask 261120  }
  0x28   : > { %v680_v1 = vld [vmem:[%s3364_s21] sm:$0xff]  ;;  %2585 = vset.pattern.permute.xlu1 %v2740_v2  ;;  %2584 = vset.pattern.permute.xlu0 %v2740_v2  ;;  %v687_v12 = vld [vmem:[%s3364_s21 + $0x38] sm:$0xff]  ;;  %v686_v13 = vld [vmem:[%s3364_s21 + $0x30] sm:$0xff]  ;;  %vm1038_vm1 = vcmask 1043456   ;;  %vm1034_vm2 = vcmask 64512   ;;  %s3371_s8 = sld [smem:[#allocation22_spill]] }
  0x29   : > { %768 = vperm.xlu1 %2585, %v684_v0   ;;  %748 = vperm.xlu0 %2584, %v680_v1   ;;  %s2903_s28 = sshll.u32 %s657_s27, 5  ;;  %v683_v15 = vld [vmem:[%s3364_s21 + $0x18] sm:$0xff]  ;;  %v685_v16 = vld [vmem:[%s3364_s21 + $0x28] sm:$0xff]  ;;  %s3373_s6 = sld [smem:[#allocation20_spill]]  ;;  %vm1698_vm3 = vcmask 130048   ;;  %vm2054_vm4 = vcmask 523264  }
  0x2a   : > { %2586 = vset.pattern.permute.xlu2 %v2740_v2  ;;  %s660_s1 = scalar_lea.vmem %s3365_s29, %s2903_s28  ;;  %s3366_s29 = sld [smem:[#allocation16_spill]] }
  0x2b   : > { %v674_v3 = vld [vmem:[%s660_s1 + $0x10] sm:$0xff]  ;;  %v675_v4 = vld [vmem:[%s660_s1 + $0x18] sm:$0xff]  ;;  %v672_v5 = vld [vmem:[%s660_s1] sm:$0xff]  ;;  %763 = vperm.xlu2 %2586, %v683_v15   ;;  %s3374_s11 = sld [smem:[#allocation25_spill]] }
  0x2c   : > { %v745_v6 = vpack.c.bf16 %v675_v4, %v674_v3  ;;  %v673_v7 = vld [vmem:[%s660_s1 + $0x8] sm:$0xff]  ;;  %s3042_s1 = scalar_lea.vmem [#allocation2], %s3342_s3  ;;  %s3376_s10 = sld [smem:[#allocation24_spill]] }
  0x2d   : > { %v744_v10 = vpack.c.bf16 %v673_v7, %v672_v5  ;;  %s3377_s12 = sld [smem:[#allocation26_spill]] }
  0x2e   : > { %861 = vmatpush.bf16.msra.mxu0 %v745_v6  ;;  %2535 = vmatpush.bf16.msra.mxu2 %v745_v6 }
  0x30   : > { %v2513_v11 = vld [vmem:[%s3366_s29] sm:$0xff]  ;;  %v2514_v14 = vld [vmem:[%s3366_s29 + $0x8] sm:$0xff]  ;;  %v2515_v17 = vld [vmem:[%s3366_s29 + $0x10] sm:$0xff] }
  0x31   : > { %758 = vperm.xlu1 %2585, %v682_v8   ;;  %753 = vperm.xlu0 %2584, %v681_v9   ;;  %v2516_v18 = vld [vmem:[%s3366_s29 + $0x18] sm:$0xff]  ;;  %v2518_v56 = vld [vmem:[%s3366_s29 + $0x28] sm:$0xff]  ;;  %v2517_v5 = vld [vmem:[%s3366_s29 + $0x20] sm:$0xff]  ;;  %s665_s29 = scalar_lea.vmem %s3370_s24, %s2903_s28  ;;  %s2218_s24 = scalar_lea.hbm %s3330_s19, %s2506_s25 }
  0x32   : > { %862 = vmatpush.bf16.msra.mxu0 %v744_v10  ;;  %2536 = vmatpush.bf16.msra.mxu2 %v744_v10  ;;  %s2222_s27 = sshll.u32 %s2218_s24, 4  ;;  %s2223_s27 = int_to_ptr.hbm [resolvable:$true] %s2222_s27 }
  0x33   : > { %773 = vperm.xlu2 %2586, %v685_v16  }
  0x35   : > { %2402 = vmatmul.msk.bf16.vlgmr.msra.gmra.mxu0 %vm836_vm0, %v2513_v11  ;;  %2407 = vmatmul.msk.bf16.vlgmr.msra.gmra.mxu2 %vm836_vm0, %v2518_v56 }
  0x39   : > { %783 = vperm.xlu1 %2585, %v687_v12   ;;  %778 = vperm.xlu0 %2584, %v686_v13  }
  0x45   : > { %2403 = vmatmul.msk.bf16.gmra.mxu0 %vm836_vm0, %v2514_v14 }
  0x55   : > { %2404 = vmatmul.msk.bf16.gmra.mxu0 %vm836_vm0, %v2515_v17  ;;  %v688_v17 = vld [vmem:[%s3364_s21 + $0x40] sm:$0xff] }
  0x65   : > { %2405 = vmatmul.msk.bf16.gmra.mxu0 %vm836_vm0, %v2516_v18  ;;  %v690_v18 = vld [vmem:[%s3364_s21 + $0x50] sm:$0xff] }
  0x75   : > { %2406 = vmatmul.msk.bf16.gmra.mxu0 %vm836_vm0, %v2517_v5 }
  0x85   : > { %v764_v33 = vpop.permute.xlu2 %763 }
  0x8d   : > { %v774_v41 = vpop.permute.xlu2 %773 }
  0x9b   : > { %v749_v19 = vpop.permute.xlu0 %748  ;;  %v769_v23 = vpop.permute.xlu1 %768 }
  0xa3   : > { %v754_v25 = vpop.permute.xlu0 %753  ;;  %v759_v27 = vpop.permute.xlu1 %758 }
  0xab   : > { %v779_v46 = vpop.permute.xlu0 %778  ;;  %v784_v51 = vpop.permute.xlu1 %783 }
  0xb2   : > { %v864_v20 = vpop.f32.mrf.mxu0 }
  0xb3   : > { %v865_v21 = vadd.f32 %v864_v20, %v749_v19  ;;  %v694_v19 = vld [vmem:[%s3367_s5 + $0x10] sm:$0xff]  ;;  %v692_v20 = vld [vmem:[%s3367_s5] sm:$0xff] }
  0xb5   : > { %v894_v22 = vmul.f32 0.35355338, %v865_v21  ;;  %v697_v21 = vld [vmem:[%s3368_s7 + $0x8] sm:$0xff] }
  0xb7   : > { %898 = vxpose.xlu2.b32.start.end [1/1] (short) (narrow) %v894_v22, 8  ;;  %v698_v22 = vld [vmem:[%s3368_s7 + $0x10] sm:$0xff] }
  0xb8   : > { %v2960_v6 = vpop.f32.mrf.mxu2 }
  0xba   : > { %v866_v24 = vpop.f32.mrf.mxu0 }
  0xbb   : > { %v867_v26 = vadd.f32 %v866_v24, %v754_v25 }
  0xbd   : > { %v895_v30 = vmul.f32 0.35355338, %v867_v26 }
  0xc0   : > { %v2962_v7 = vpop.f32.mrf.mxu2 }
  0xc2   : > { %v869_v28 = vpop.f32.mrf.mxu0 }
  0xc3   : > { %v870_v29 = vadd.f32 %v869_v28, %v759_v27 }
  0xc5   : > { %v896_v31 = vmul.f32 0.35355338, %v870_v29 }
  0xc7   : > { %v2587_v32 = vpack.i.bf16 %v896_v31, %v895_v30 }
  0xc9   : > { %2588 = vxpose.xlu0.b32.start.end [1/1] (short) (narrow) %v2587_v32, 8 }
  0xca   : > { %v871_v34 = vpop.f32.mrf.mxu0 }
  0xcb   : > { %v872_v35 = vadd.f32 %v871_v34, %v764_v33 }
  0xcd   : > { %v897_v36 = vmul.f32 0.35355338, %v872_v35 }
  0xcf   : > { %994 = vxpose.xlu1.b32.start.end [1/1] (short) (narrow) %v897_v36, 8 }
  0xd2   : > { %v874_v37 = vpop.f32.mrf.mxu0 }
  0xd3   : > { %v875_v38 = vadd.f32 %v874_v37, %v769_v23  ;;  %v703_v23 = vld [vmem:[%s3369_s9 + $0x18] sm:$0xff] }
  0xd5   : > { %v1030_v39 = vpack.c.bf16 %v875_v38, %v875_v38 }
  0xd7   : > { %v1040_v40 = vsel %vm1038_vm1, %v1030_v39, 0 }
  0xd8   : > { %1049 = vmatpush.bf16.msra.mxu1 %v1040_v40 }
  0xda   : > { %v876_v42 = vpop.f32.mrf.mxu0 }
  0xdb   : > { %v877_v43 = vadd.f32 %v876_v42, %v774_v41 }
  0xdd   : > { %v1031_v44 = vpack.c.bf16 %v877_v43, %v877_v43 }
  0xdf   : > { %v1059_v45 = vsel %vm1038_vm1, %v1031_v44, 0  ;;  %v691_v44 = vld [vmem:[%s3364_s21 + $0x58] sm:$0xff] }
  0xe0   : > { %1068 = vmatpush.bf16.msrb.mxu2 %v1059_v45  ;;  %v695_v45 = vld [vmem:[%s3367_s5 + $0x18] sm:$0xff] }
  0xe2   : > { %v879_v47 = vpop.f32.mrf.mxu0 }
  0xe3   : > { %v880_v48 = vadd.f32 %v879_v47, %v779_v46  ;;  %v689_v46 = vld [vmem:[%s3364_s21 + $0x48] sm:$0xff] }
  0xe4   : > { %v693_v47 = vld [vmem:[%s3367_s5 + $0x8] sm:$0xff]  ;;  %s3375_s5 = sshll.u32 %s3031_s23, 3 }
  0xe5   : > { %v1032_v49 = vpack.c.bf16 %v880_v48, %v880_v48  ;;  %v696_v48 = vld [vmem:[%s3368_s7] sm:$0xff]  ;;  %s3195_s3 = scalar_lea.vmem [#allocation4], %s3375_s5 }
  0xe7   : > { %v1078_v50 = vsel %vm1038_vm1, %v1032_v49, 0  ;;  %v700_v49 = vld [vmem:[%s3369_s9] sm:$0xff] }
  0xe8   : > { %1087 = vmatpush.bf16.msra.mxu3 %v1078_v50  ;;  %v701_v50 = vld [vmem:[%s3369_s9 + $0x8] sm:$0xff] }
  0xea   : > { %v881_v52 = vpop.f32.mrf.mxu0 }
  0xeb   : > { %v882_v53 = vadd.f32 %v881_v52, %v784_v51  ;;  %v699_v51 = vld [vmem:[%s3368_s7 + $0x18] sm:$0xff]  ;;  %v702_v52 = vld [vmem:[%s3369_s9 + $0x10] sm:$0xff]  ;;  %s2220_s7 = sshll.u32 %s3042_s1, 4  ;;  %s2221_s7 = int_to_ptr.vmem [resolvable:$true] %s2220_s7 }
  0xed   : > { %v1033_v54 = vpack.c.bf16 %v882_v53, %v882_v53 }
  0xef   : > { %v1097_v55 = vsel %vm1038_vm1, %v1033_v54, 0 }
  0xf0   : > { %1106 = vmatpush.bf16.msrb.mxu1 %v1097_v55 }
 0x150   : > { %v914_v57 = vpop.trf.xlu2 }
 0x151   : > { %v1026_v58 = vpack.c.bf16 %v914_v57, %v914_v57  ;;  %v884_v57 = vpop.f32.mrf.mxu0 }
 0x153   : > { %2408 = vmatmul.msk.bf16.vlgmr.msra.gmra.mxu1 %vm1034_vm2, %v1026_v58 }
 0x16d   : > { %v2589_v59 = vpop.trf.xlu0 }
 0x16e   : > { %v2590_v60 = vunpack.i.l.bf16 %v2589_v59  ;;  %v2593_v61 = vunpack.i.h.bf16 %v2589_v59 }
 0x170   : > { %v1027_v62 = vpack.c.bf16 %v2590_v60, %v2590_v60  ;;  %v1028_v63 = vpack.c.bf16 %v2593_v61, %v2593_v61 }
 0x172   : > { %2409 = vmatmul.msk.bf16.vlgmr.msrb.gmra.mxu2 %vm1034_vm2, %v1027_v62  ;;  %2410 = vmatmul.msk.bf16.vlgmr.msra.gmra.mxu3 %vm1034_vm2, %v1028_v63 }
 0x173   : > { %v1010_v0 = vpop.trf.xlu1 }
 0x174   : > { %v1029_v1 = vpack.c.bf16 %v1010_v0, %v1010_v0 }
 0x176   : > { %2411 = vmatmul.msk.bf16.vlgmr.msrb.gmra.mxu1 %vm1034_vm2, %v1029_v1 }
 0x1d0   : > { %v1051_v2 = vpop.f32.mrf.mxu1 }
 0x1d1   : > { %v1112_v3 = vsel %vm1034_vm2, %v1051_v2, -inf }
 0x1d2   : > { %1113 = vmax.xlane.f32.xlu2 %v1112_v3 }
 0x1d8   : > { %v1053_v4 = vpop.f32.mrf.mxu1 }
 0x1f3   : > { %v1108_v8 = vpop.f32.mrf.mxu1 }
 0x1f4   : > { %v1121_v9 = vsel %vm1034_vm2, %v1108_v8, -inf }
 0x1f5   : > { %v1070_v10 = vpop.f32.mrf.mxu2  ;;  %v1089_v11 = vpop.f32.mrf.mxu3  ;;  %1122 = vmax.xlane.f32.xlu0 %v1121_v9 }
 0x1f6   : > { %v1115_v12 = vsel %vm1034_vm2, %v1070_v10, -inf  ;;  %v1118_v13 = vsel %vm1034_vm2, %v1089_v11, -inf }
 0x1f7   : > { %1116 = vmax.xlane.f32.xlu1 %v1115_v12  ;;  %1119 = vmax.xlane.f32.xlu2 %v1118_v13 }
 0x1fb   : > { %v1110_v14 = vpop.f32.mrf.mxu1 }
 0x1fd   : > { %v1072_v15 = vpop.f32.mrf.mxu2  ;;  %v1091_v16 = vpop.f32.mrf.mxu3 }
 0x210   : > { %788 = vperm.xlu1 %2585, %v688_v17   ;;  %v678_v17 = vld [vmem:[%s665_s29 + $0x10] sm:$0xff] }
 0x218   : > { %798 = vperm.xlu1 %2585, %v690_v18   ;;  %v679_v18 = vld [vmem:[%s665_s29 + $0x18] sm:$0xff] }
 0x220   : > { %1266 = vperm.xlu1 %2585, %v694_v19   ;;  %v886_v19 = vpop.f32.mrf.mxu0 }
 0x228   : > { %1256 = vperm.xlu1 %2585, %v692_v20  }
 0x230   : > { %1323 = vperm.xlu1 %2585, %v697_v21  }
 0x238   : > { %1328 = vperm.xlu1 %2585, %v698_v22  }
 0x240   : > { %1402 = vperm.xlu1 %2585, %v703_v23  }
 0x245   : > { %v1114_v24 = vpop.xlane.xlu2 %1113 }
 0x246   : > { %v1124_v25 = vsub.f32 %v1051_v2, %v1114_v24 }
 0x248   : > { %v1128_v26 = vmul.f32 1.442695, %v1124_v25 }
 0x24a   : > { %2608 = vpow2.f32 %v1128_v26 }
 0x250   : > { %v2609_v27 = vpop.eup %2608 }
 0x251   : > { %v1136_v28 = vsel %vm1034_vm2, %v2609_v27, 0.0 }
 0x252   : > { %1137 = vadd.xlane.f32.xlu0 %v1136_v28 }
 0x268   : > { %v1123_v31 = vpop.xlane.xlu0 %1122 }
 0x269   : > { %v1127_v36 = vsub.f32 %v1108_v8, %v1123_v31  ;;  %v677_v31 = vld [vmem:[%s665_s29 + $0x8] sm:$0xff] }
 0x26a   : > { %v1117_v29 = vpop.xlane.xlu1 %1116  ;;  %v1120_v30 = vpop.xlane.xlu2 %1119 }
 0x26b   : > { %v1125_v32 = vsub.f32 %v1070_v10, %v1117_v29  ;;  %v1126_v33 = vsub.f32 %v1089_v11, %v1120_v30  ;;  %v1134_v37 = vmul.f32 1.442695, %v1127_v36  ;;  %v676_v30 = vld [vmem:[%s665_s29] sm:$0xff]  ;;  %s3372_s29 = sld [smem:[#allocation18_spill]] }
 0x26c   : > { %v1383_v36 = vpack.c.bf16 %v677_v31, %v676_v30 }
 0x26d   : > { %v1130_v34 = vmul.f32 1.442695, %v1125_v32  ;;  %v1132_v35 = vmul.f32 1.442695, %v1126_v33 }
 0x26f   : > { %2610 = vpow2.f32 %v1130_v34 }
 0x270   : > { %2612 = vpow2.f32 %v1132_v35 }
 0x271   : > { %2614 = vpow2.f32 %v1134_v37 }
 0x275   : > { %v2611_v38 = vpop.eup %2610 }
 0x276   : > { %v2613_v39 = vpop.eup %2612  ;;  %v1139_v40 = vsel %vm1034_vm2, %v2611_v38, 0.0 }
 0x277   : > { %v1142_v41 = vsel %vm1034_vm2, %v2613_v39, 0.0  ;;  %1140 = vadd.xlane.f32.xlu0 %v1139_v40  ;;  %v2615_v42 = vpop.eup %2614 }
 0x278   : > { %1143 = vadd.xlane.f32.xlu2 %v1142_v41  ;;  %v1145_v43 = vsel %vm1034_vm2, %v2615_v42, 0.0 }
 0x280   : > { %1146 = vadd.xlane.f32.xlu2 %v1145_v43 }
 0x282   : > { %v789_v58 = vpop.permute.xlu1 %788 }
 0x283   : > { %v885_v60 = vadd.f32 %v884_v57, %v789_v58 }
 0x285   : > { %v1164_v61 = vpack.c.bf16 %v885_v60, %v885_v60 }
 0x28a   : > { %v799_v10 = vpop.permute.xlu1 %798 }
 0x28b   : > { %803 = vperm.xlu0 %2584, %v691_v44   ;;  %v890_v15 = vadd.f32 %v2960_v6, %v799_v10 }
 0x28d   : > { %v1166_v25 = vpack.c.bf16 %v890_v15, %v890_v15 }
 0x293   : > { %1271 = vperm.xlu0 %2584, %v695_v45  }
 0x298   : > { %793 = vperm.xlu2 %2586, %v689_v46  }
 0x29b   : > { %1261 = vperm.xlu0 %2584, %v693_v47  }
 0x2a0   : > { %1318 = vperm.xlu2 %2586, %v696_v48  }
 0x2a3   : > { %1387 = vperm.xlu0 %2584, %v700_v49  }
 0x2a8   : > { %1392 = vperm.xlu2 %2586, %v701_v50   ;;  %v2519_v50 = vld [vmem:[%s3372_s29] sm:$0xff] }
 0x2ab   : > { %1333 = vperm.xlu0 %2584, %v699_v51  }
 0x2b0   : > { %1397 = vperm.xlu2 %2586, %v702_v52  }
 0x2c5   : > { %v1138_v53 = vpop.xlane.xlu0 %1137 }
 0x2c6   : > { %2616 = vrcp.f32 %v1138_v53 }
 0x2cc   : > { %v2617_v54 = vpop.eup %2616 }
 0x2cd   : > { %v1152_v55 = vmul.f32 %v2617_v54, %v2609_v27  ;;  %v1384_v27 = vpack.c.bf16 %v679_v18, %v678_v17 }
 0x2cf   : > { %v1168_v56 = vpack.c.bf16 %v1152_v55, %v1152_v55  ;;  %v1156_v12 = vsel %vm1034_vm2, %v1152_v55, 0.0 }
 0x2d1   : > { %v1176_v59 = vsel %vm1034_vm2, %v1168_v56, 0 }
 0x2d2   : > { %1185 = vmatpush.bf16.xpose.msra.mxu2 %v1176_v59  ;;  %v2520_v59 = vld [vmem:[%s3372_s29 + $0x8] sm:$0xff] }
 0x2d9   : > { %2412 = vmatmul.msk.bf16.vlgmr.msra.gmra.mxu2 %vm1034_vm2, %v1164_v61 }
 0x2ea   : > { %v1141_v62 = vpop.xlane.xlu0 %1140 }
 0x2eb   : > { %v1144_v63 = vpop.xlane.xlu2 %1143  ;;  %2618 = vrcp.f32 %v1141_v62 }
 0x2ec   : > { %2620 = vrcp.f32 %v1144_v63 }
 0x2f1   : > { %v2619_v0 = vpop.eup %2618 }
 0x2f2   : > { %v2621_v1 = vpop.eup %2620  ;;  %v1153_v2 = vmul.f32 %v2619_v0, %v2611_v38  ;;  %v2523_v38 = vld [vmem:[%s3371_s8] sm:$0xff] }
 0x2f3   : > { %v1147_v3 = vpop.xlane.xlu2 %1146  ;;  %v1154_v4 = vmul.f32 %v2621_v1, %v2613_v39 }
 0x2f4   : > { %2622 = vrcp.f32 %v1147_v3  ;;  %v1169_v5 = vpack.c.bf16 %v1153_v2, %v1153_v2  ;;  %v1157_v8 = vsel %vm1034_vm2, %v1153_v2, 0.0  ;;  %v1267_v2 = vpop.permute.xlu1 %1266 }
 0x2f5   : > { %v1170_v9 = vpack.c.bf16 %v1154_v4, %v1154_v4  ;;  %v1158_v14 = vadd.f32 %v1157_v8, %v1156_v12  ;;  %v1159_v20 = vsel %vm1034_vm2, %v1154_v4, 0.0 }
 0x2f6   : > { %v1195_v11 = vsel %vm1034_vm2, %v1169_v5, 0 }
 0x2f7   : > { %1204 = vmatpush.bf16.xpose.msrb.mxu3 %v1195_v11  ;;  %v1214_v13 = vsel %vm1034_vm2, %v1170_v9, 0  ;;  %v1160_v24 = vadd.f32 %v1159_v20, %v1158_v14 }
 0x2f8   : > { %1223 = vmatpush.bf16.xpose.msra.mxu1 %v1214_v13 }
 0x2fa   : > { %v2623_v16 = vpop.eup %2622 }
 0x2fb   : > { %v794_v21 = vpop.permute.xlu2 %793  ;;  %v1155_v22 = vmul.f32 %v2623_v16, %v2615_v42 }
 0x2fc   : > { %v887_v23 = vadd.f32 %v886_v19, %v794_v21  ;;  %v1257_v3 = vpop.permute.xlu1 %1256 }
 0x2fd   : > { %v1171_v26 = vpack.c.bf16 %v1155_v22, %v1155_v22  ;;  %v1161_v6 = vsel %vm1034_vm2, %v1155_v22, 0.0  ;;  %v804_v29 = vpop.permute.xlu0 %803 }
 0x2fe   : > { %v1165_v28 = vpack.c.bf16 %v887_v23, %v887_v23  ;;  %v1162_v32 = vadd.f32 %v1161_v6, %v1160_v24  ;;  %v892_v35 = vadd.f32 %v2962_v7, %v804_v29  ;;  %v2524_v7 = vld [vmem:[%s3371_s8 + $0x8] sm:$0xff]  ;;  %v2521_v24 = vld [vmem:[%s3373_s6] sm:$0xff] }
 0x2ff   : > { %2414 = vmatmul.msk.bf16.vlgmr.msra.gmra.mxu1 %vm1034_vm2, %v1166_v25  ;;  %v1233_v33 = vsel %vm1034_vm2, %v1171_v26, 0 }
 0x300   : > { %2413 = vmatmul.msk.bf16.vlgmr.msrb.gmra.mxu3 %vm1034_vm2, %v1165_v28  ;;  %1242 = vmatpush.bf16.xpose.msrb.mxu2 %v1233_v33  ;;  %v1163_v34 = vmul.f32 0.25, %v1162_v32  ;;  %v1167_v37 = vpack.c.bf16 %v892_v35, %v892_v35 }
 0x302   : > { %1309 = vst.msk [vmem:[%s3042_s1] sm:$0xff] %vm1034_vm2, %v1163_v34 }
 0x303   : > { %v1319_v52 = vpop.permute.xlu2 %1318 }
 0x304   : > { %v1324_v5 = vpop.permute.xlu1 %1323 }
 0x305   : > { %v1272_v44 = vpop.permute.xlu0 %1271 }
 0x307   : > { %2415 = vmatmul.msk.bf16.vlgmr.msrb.gmra.mxu2 %vm1034_vm2, %v1167_v37 }
 0x308   : > { %1463 = vmatpush.bf16.msra.mxu2 %v1384_v27  ;;  %v2522_v27 = vld [vmem:[%s3373_s6 + $0x8] sm:$0xff] }
 0x30b   : > { %v1393_v58 = vpop.permute.xlu2 %1392 }
 0x30c   : > { %1464 = vmatpush.bf16.msra.mxu2 %v1383_v36  ;;  %v1329_v10 = vpop.permute.xlu1 %1328 }
 0x30d   : > { %v1262_v49 = vpop.permute.xlu0 %1261 }
 0x313   : > { %v1398_v61 = vpop.permute.xlu2 %1397 }
 0x314   : > { %v1403_v16 = vpop.permute.xlu1 %1402 }
 0x315   : > { %v1388_v53 = vpop.permute.xlu0 %1387 }
 0x317   : > { %2452 = vmatmul.msk.bf16.vlgmr.msra.gmra.mxu2 %vm836_vm0, %v2523_v38 }
 0x31d   : > { %v1334_v36 = vpop.permute.xlu0 %1333 }
 0x327   : > { %2453 = vmatmul.msk.bf16.gmra.mxu2 %vm836_vm0, %v2524_v7 }
 0x35c   : > { %v1187_v39 = vpop.f32.mrf.mxu2 }
 0x364   : > { %v1189_v40 = vpop.f32.mrf.mxu2 }
 0x37c   : > { %v1225_v41 = vpop.f32.mrf.mxu1 }
 0x383   : > { %v1206_v42 = vpop.f32.mrf.mxu3 }
 0x384   : > { %v1227_v43 = vpop.f32.mrf.mxu1  ;;  %v1252_v48 = vpack.c.bf16 %v1206_v42, %v1187_v39 }
 0x38a   : > { %v1244_v45 = vpop.f32.mrf.mxu2 }
 0x38b   : > { %v1253_v46 = vpack.c.bf16 %v1244_v45, %v1225_v41  ;;  %v1208_v47 = vpop.f32.mrf.mxu3  ;;  %v2525_v41 = vld [vmem:[%s3371_s8 + $0x10] sm:$0xff] }
 0x38c   : > { %2454 = vmatmul.msk.bf16.gmra.mxu2 %vm836_vm0, %v2525_v41  ;;  %v2526_v47 = vld [vmem:[%s3371_s8 + $0x18] sm:$0xff] }
 0x38d   : > { %1296 = vmatpush.bf16.msra.mxu3 %v1253_v46  ;;  %v711_v41 = vld [vmem:[%s3374_s11 + $0x18] sm:$0xff] }
 0x391   : > { %1297 = vmatpush.bf16.msra.mxu3 %v1252_v48 }
 0x392   : > { %v1246_v51 = vpop.f32.mrf.mxu2 }
 0x394   : > { %2424 = vmatmul.msk.bf16.vlgmr.msra.gmra.mxu3 %vm836_vm0, %v2519_v50 }
 0x39a   : > { %v1466_v54 = vpop.f32.mrf.mxu2 }
 0x39b   : > { %v1467_v55 = vadd.f32 %v1466_v54, %v1388_v53 }
 0x39c   : > { %2455 = vmatmul.msk.bf16.gmra.mxu2 %vm836_vm0, %v2526_v47  ;;  %v727_v47 = vld [vmem:[%s3327_s16 + $0x18] sm:$0xff] }
 0x39d   : > { %v1618_v56 = vpack.c.bf16 %v1467_v55, %v1467_v55 }
 0x39f   : > { %v1626_v57 = vsel %vm1038_vm1, %v1618_v56, 0 }
 0x3a0   : > { %1635 = vmatpush.bf16.msrb.mxu3 %v1626_v57 }
 0x3a2   : > { %v1468_v60 = vpop.f32.mrf.mxu2 }
 0x3a3   : > { %v1469_v12 = vadd.f32 %v1468_v60, %v1393_v58 }
 0x3a4   : > { %2425 = vmatmul.msk.bf16.gmra.mxu3 %vm836_vm0, %v2520_v59 }
 0x3a5   : > { %v1619_v20 = vpack.c.bf16 %v1469_v12, %v1469_v12  ;;  %v719_v12 = vld [vmem:[%s3324_s13 + $0x38] sm:$0xff] }
 0x3a7   : > { %v1645_v25 = vsel %vm1038_vm1, %v1619_v20, 0  ;;  %v728_v20 = vld [vmem:[%s3328_s17] sm:$0xff] }
 0x3aa   : > { %v1471_v62 = vpop.f32.mrf.mxu2 }
 0x3ab   : > { %v1472_v63 = vadd.f32 %v1471_v62, %v1398_v61 }
 0x3ad   : > { %v1620_v0 = vpack.c.bf16 %v1472_v63, %v1472_v63  ;;  %v706_v63 = vld [vmem:[%s3369_s9 + $0x30] sm:$0xff] }
 0x3af   : > { %v1664_v1 = vsel %vm1038_vm1, %v1620_v0, 0 }
 0x3b0   : > { %1673 = vmatpush.bf16.msra.mxu3 %v1664_v1 }
 0x3b2   : > { %v1473_v13 = vpop.f32.mrf.mxu2 }
 0x3b3   : > { %v1474_v19 = vadd.f32 %v1473_v13, %v1403_v16  ;;  %v723_v13 = vld [vmem:[%s3326_s15 + $0x18] sm:$0xff]  ;;  %v713_v16 = vld [vmem:[%s3324_s13 + $0x8] sm:$0xff] }
 0x3b5   : > { %v1621_v23 = vpack.c.bf16 %v1474_v19, %v1474_v19  ;;  %v725_v19 = vld [vmem:[%s3327_s16 + $0x8] sm:$0xff] }
 0x3b7   : > { %v1683_v26 = vsel %vm1038_vm1, %v1621_v23, 0 }
 0x417   : > { %v1299_v4 = vpop.f32.mrf.mxu3 }
 0x418   : > { %v1300_v21 = vadd.f32 %v1299_v4, %v1257_v3  ;;  %v707_v3 = vld [vmem:[%s3369_s9 + $0x38] sm:$0xff]  ;;  %v716_v4 = vld [vmem:[%s3324_s13 + $0x20] sm:$0xff] }
 0x41f   : > { %v1301_v8 = vpop.f32.mrf.mxu3 }
 0x420   : > { %v1302_v17 = vadd.f32 %v1301_v8, %v1262_v49  ;;  %v704_v8 = vld [vmem:[%s3369_s9 + $0x20] sm:$0xff] }
 0x422   : > { %v1314_v22 = vpack.c.bf16 %v1302_v17, %v1300_v21  ;;  %v729_v17 = vld [vmem:[%s3328_s17 + $0x8] sm:$0xff]  ;;  %v731_v21 = vld [vmem:[%s3328_s17 + $0x18] sm:$0xff] }
 0x427   : > { %v1304_v9 = vpop.f32.mrf.mxu3 }
 0x428   : > { %v1305_v14 = vadd.f32 %v1304_v9, %v1267_v2  ;;  %v709_v2 = vld [vmem:[%s3374_s11 + $0x8] sm:$0xff]  ;;  %v715_v9 = vld [vmem:[%s3324_s13 + $0x18] sm:$0xff] }
 0x42f   : > { %v1306_v11 = vpop.f32.mrf.mxu3 }
 0x430   : > { %v1307_v15 = vadd.f32 %v1306_v11, %v1272_v44  ;;  %v720_v11 = vld [vmem:[%s3326_s15] sm:$0xff] }
 0x432   : > { %v1315_v18 = vpack.c.bf16 %v1307_v15, %v1305_v14  ;;  %v714_v14 = vld [vmem:[%s3324_s13 + $0x10] sm:$0xff] }
 0x433   : > { %v726_v15 = vld [vmem:[%s3327_s16 + $0x10] sm:$0xff] }
 0x434   : > { %1358 = vmatpush.bf16.msrb.mxu1 %v1315_v18  ;;  %v722_v18 = vld [vmem:[%s3326_s15 + $0x10] sm:$0xff] }
 0x438   : > { %1359 = vmatpush.bf16.msrb.mxu1 %v1314_v22 }
 0x43b   : > { %2434 = vmatmul.msk.bf16.vlgmr.msrb.gmra.mxu1 %vm836_vm0, %v2521_v24 }
 0x43c   : > { %1654 = vmatpush.bf16.msra.mxu1 %v1645_v25 }
 0x440   : > { %1692 = vmatpush.bf16.msrb.mxu1 %v1683_v26 }
 0x44b   : > { %2435 = vmatmul.msk.bf16.gmra.mxu1 %vm836_vm0, %v2522_v27 }
 0x4b8   : > { %v1361_v6 = vpop.f32.mrf.mxu1 }
 0x4b9   : > { %v1362_v28 = vadd.f32 %v1361_v6, %v1319_v52 }
 0x4bb   : > { %v1371_v31 = vmul.f32 0.35355338, %v1362_v28 }
 0x4c0   : > { %v1363_v29 = vpop.f32.mrf.mxu1 }
 0x4c1   : > { %v1364_v30 = vadd.f32 %v1363_v29, %v1324_v5  ;;  %v710_v5 = vld [vmem:[%s3374_s11 + $0x10] sm:$0xff] }
 0x4c3   : > { %v1372_v32 = vmul.f32 0.35355338, %v1364_v30 }
 0x4c5   : > { %v2594_v33 = vpack.i.bf16 %v1372_v32, %v1371_v31 }
 0x4c7   : > { %2595 = vxpose.xlu0.b32.start.end [1/1] (short) (narrow) %v2594_v33, 8 }
 0x4c8   : > { %v1366_v34 = vpop.f32.mrf.mxu1 }
 0x4c9   : > { %v1367_v35 = vadd.f32 %v1366_v34, %v1329_v10  ;;  %v708_v10 = vld [vmem:[%s3374_s11] sm:$0xff]  ;;  %s2658_s11 = sshra.s32 %s2223_s27, 4  ;;  %s2659_s11 = int_to_ptr.hbm [resolvable:$true] %s2658_s11 }
 0x4ca   : > { %p2665_p0 = scmp.lt.s32.totalorder %s2659_s11, %s3330_s19 }
 0x4cb   : > { %v1373_v7 = vmul.f32 0.35355338, %v1367_v35 }
 0x4d0   : > { %v1368_v37 = vpop.f32.mrf.mxu1 }
 0x4d1   : > { %v1369_v38 = vadd.f32 %v1368_v37, %v1334_v36 }
 0x4d3   : > { %v1374_v39 = vmul.f32 0.35355338, %v1369_v38 }
 0x4d5   : > { %v2601_v40 = vpack.i.bf16 %v1374_v39, %v1373_v7 }
 0x4d7   : > { %2602 = vxpose.xlu2.b32.start.end [1/1] (short) (narrow) %v2601_v40, 8  ;;  %v705_v40 = vld [vmem:[%s3369_s9 + $0x28] sm:$0xff]  ;;  %s2232_s9 = scalar_lea.hbm %s3331_s20, %s2506_s25 }
 0x56b   : > { %v2596_v42 = vpop.trf.xlu0 }
 0x56c   : > { %v2600_v43 = vunpack.i.h.bf16 %v2596_v42  ;;  %v2597_v44 = vunpack.i.l.bf16 %v2596_v42  ;;  %v718_v42 = vld [vmem:[%s3324_s13 + $0x30] sm:$0xff] }
 0x56e   : > { %v1615_v45 = vpack.c.bf16 %v2600_v43, %v2600_v43  ;;  %v1614_v46 = vpack.c.bf16 %v2597_v44, %v2597_v44  ;;  %v717_v43 = vld [vmem:[%s3324_s13 + $0x28] sm:$0xff]  ;;  %v712_v44 = vld [vmem:[%s3324_s13] sm:$0xff] }
 0x570   : > { %2456 = vmatmul.msk.bf16.vlgmr.msrb.gmra.mxu3 %vm1034_vm2, %v1614_v46  ;;  %2457 = vmatmul.msk.bf16.vlgmr.msra.gmra.mxu1 %vm1034_vm2, %v1615_v45  ;;  %v2603_v48 = vpop.trf.xlu2  ;;  %v721_v45 = vld [vmem:[%s3326_s15 + $0x8] sm:$0xff]  ;;  %v724_v46 = vld [vmem:[%s3327_s16] sm:$0xff] }
 0x571   : > { %v2607_v49 = vunpack.i.h.bf16 %v2603_v48  ;;  %v2604_v50 = vunpack.i.l.bf16 %v2603_v48 }
 0x573   : > { %v1617_v51 = vpack.c.bf16 %v2607_v49, %v2607_v49  ;;  %v1616_v52 = vpack.c.bf16 %v2604_v50, %v2604_v50  ;;  %v730_v49 = vld [vmem:[%s3328_s17 + $0x10] sm:$0xff] }
 0x580   : > { %2458 = vmatmul.msk.bf16.vlgmr.msra.gmra.mxu3 %vm1034_vm2, %v1616_v52  ;;  %2459 = vmatmul.msk.bf16.vlgmr.msrb.gmra.mxu1 %vm1034_vm2, %v1617_v51  ;;  %v1476_v52 = vpop.f32.mrf.mxu2 }
 0x5ed   : > { %v1656_v53 = vpop.f32.mrf.mxu1 }
 0x5ee   : > { %v1702_v54 = vsel %vm1698_vm3, %v1656_v53, -inf }
 0x5ef   : > { %1703 = vmax.xlane.f32.xlu2 %v1702_v54 }
 0x5f3   : > { %v1637_v55 = vpop.f32.mrf.mxu3 }
 0x5f4   : > { %v1699_v56 = vsel %vm1698_vm3, %v1637_v55, -inf }
 0x5f5   : > { %v1658_v57 = vpop.f32.mrf.mxu1  ;;  %1700 = vmax.xlane.f32.xlu1 %v1699_v56 }
 0x5fb   : > { %v1639_v58 = vpop.f32.mrf.mxu3 }
 0x5fd   : > { %v3089_v59 = vpop.f32.mrf.mxu1 }
 0x5fe   : > { %v1708_v60 = vsel %vm1698_vm3, %v3089_v59, -inf }
 0x5ff   : > { %1709 = vmax.xlane.f32.xlu0 %v1708_v60 }
 0x603   : > { %v1675_v61 = vpop.f32.mrf.mxu3 }
 0x604   : > { %v1705_v62 = vsel %vm1698_vm3, %v1675_v61, -inf }
 0x605   : > { %v1696_v0 = vpop.f32.mrf.mxu1  ;;  %1706 = vmax.xlane.f32.xlu1 %v1705_v62 }
 0x607   : > { %1417 = vperm.xlu2 %2586, %v706_v63  }
 0x60b   : > { %v1677_v1 = vpop.f32.mrf.mxu3 }
 0x60f   : > { %1848 = vperm.xlu2 %2586, %v709_v2  }
 0x613   : > { %1422 = vperm.xlu0 %2584, %v707_v3  }
 0x617   : > { %1929 = vperm.xlu2 %2586, %v716_v4  }
 0x61b   : > { %1853 = vperm.xlu0 %2584, %v710_v5  }
 0x61e   : > { %1407 = vperm.xlu1 %2585, %v704_v8  }
 0x61f   : > { %1924 = vperm.xlu2 %2586, %v715_v9  }
 0x623   : > { %1843 = vperm.xlu0 %2584, %v708_v10  }
 0x627   : > { %2026 = vperm.xlu2 %2586, %v720_v11  }
 0x62b   : > { %1944 = vperm.xlu0 %2584, %v719_v12  }
 0x62f   : > { %2041 = vperm.xlu2 %2586, %v723_v13  }
 0x633   : > { %1919 = vperm.xlu0 %2584, %v714_v14  }
 0x637   : > { %2154 = vperm.xlu2 %2586, %v726_v15  }
 0x63b   : > { %1914 = vperm.xlu0 %2584, %v713_v16  }
 0x63f   : > { %2173 = vperm.xlu2 %2586, %v729_v17  }
 0x643   : > { %2036 = vperm.xlu0 %2584, %v722_v18  }
 0x64b   : > { %2149 = vperm.xlu0 %2584, %v725_v19  }
 0x653   : > { %2168 = vperm.xlu0 %2584, %v728_v20  }
 0x65b   : > { %2183 = vperm.xlu0 %2584, %v731_v21  }
 0x662   : > { %v1704_v22 = vpop.xlane.xlu2 %1703 }
 0x663   : > { %v1712_v25 = vsub.f32 %v1656_v53, %v1704_v22 }
 0x665   : > { %v1717_v27 = vmul.f32 1.442695, %v1712_v25 }
 0x668   : > { %v1701_v23 = vpop.xlane.xlu1 %1700 }
 0x669   : > { %v1711_v24 = vsub.f32 %v1637_v55, %v1701_v23 }
 0x66a   : > { %v1418_v8 = vpop.permute.xlu2 %1417 }
 0x66b   : > { %v1715_v26 = vmul.f32 1.442695, %v1711_v24 }
 0x66d   : > { %2624 = vpow2.f32 %v1715_v26 }
 0x66e   : > { %2626 = vpow2.f32 %v1717_v27 }
 0x672   : > { %v1710_v29 = vpop.xlane.xlu0 %1709 }
 0x673   : > { %v2625_v6 = vpop.eup %2624  ;;  %v1714_v33 = vsub.f32 %v3089_v59, %v1710_v29 }
 0x674   : > { %v1723_v28 = vsel %vm1698_vm3, %v2625_v6, 0.0  ;;  %v2627_v31 = vpop.eup %2626 }
 0x675   : > { %1724 = vadd.xlane.f32.xlu1 %v1723_v28  ;;  %v1726_v35 = vsel %vm1698_vm3, %v2627_v31, 0.0  ;;  %v1721_v36 = vmul.f32 1.442695, %v1714_v33 }
 0x678   : > { %v1707_v30 = vpop.xlane.xlu1 %1706 }
 0x679   : > { %v1713_v32 = vsub.f32 %v1675_v61, %v1707_v30  ;;  %v1478_v61 = vpop.f32.mrf.mxu2 }
 0x67b   : > { %v1719_v34 = vmul.f32 1.442695, %v1713_v32 }
 0x67d   : > { %2628 = vpow2.f32 %v1719_v34  ;;  %1727 = vadd.xlane.f32.xlu1 %v1726_v35 }
 0x67e   : > { %2630 = vpow2.f32 %v1721_v36 }
 0x681   : > { %v1481_v5 = vpop.f32.mrf.mxu2 }
 0x682   : > { %v1482_v11 = vadd.f32 %v1481_v5, %v1418_v8 }
 0x683   : > { %v2629_v37 = vpop.eup %2628 }
 0x684   : > { %v1729_v38 = vsel %vm1698_vm3, %v2629_v37, 0.0  ;;  %v2631_v7 = vpop.eup %2630  ;;  %v1753_v18 = vpack.c.bf16 %v1482_v11, %v1482_v11 }
 0x685   : > { %1730 = vadd.xlane.f32.xlu1 %v1729_v38  ;;  %v1732_v39 = vsel %vm1698_vm3, %v2631_v7, 0.0  ;;  %v1423_v22 = vpop.permute.xlu0 %1422 }
 0x689   : > { %v1483_v21 = vpop.f32.mrf.mxu2 }
 0x68a   : > { %v1484_v26 = vadd.f32 %v1483_v21, %v1423_v22 }
 0x68c   : > { %v1754_v27 = vpack.c.bf16 %v1484_v26, %v1484_v26 }
 0x68d   : > { %1733 = vadd.xlane.f32.xlu1 %v1732_v39 }
 0x690   : > { %v1408_v48 = vpop.permute.xlu1 %1407 }
 0x691   : > { %v1477_v57 = vadd.f32 %v1476_v52, %v1408_v48 }
 0x693   : > { %v1751_v62 = vpack.c.bf16 %v1477_v57, %v1477_v57  ;;  %v2531_v57 = vld [vmem:[%s3377_s12 + $0x10] sm:$0xff] }
 0x6a6   : > { %1412 = vperm.xlu1 %2585, %v705_v40   ;;  %v2528_v40 = vld [vmem:[%s3376_s10 + $0x8] sm:$0xff] }
 0x6ae   : > { %1858 = vperm.xlu1 %2585, %v711_v41  }
 0x6b6   : > { %1939 = vperm.xlu1 %2585, %v718_v42  }
 0x6be   : > { %1934 = vperm.xlu1 %2585, %v717_v43  }
 0x6c6   : > { %1909 = vperm.xlu1 %2585, %v712_v44   ;;  %v1854_v44 = vpop.permute.xlu0 %1853 }
 0x6ce   : > { %2031 = vperm.xlu1 %2585, %v721_v45   ;;  %v1844_v52 = vpop.permute.xlu0 %1843 }
 0x6d6   : > { %2144 = vperm.xlu1 %2585, %v724_v46  }
 0x6de   : > { %2159 = vperm.xlu1 %2585, %v727_v47  }
 0x6e6   : > { %2178 = vperm.xlu1 %2585, %v730_v49   ;;  %v1849_v49 = vpop.permute.xlu2 %1848 }
 0x6e8   : > { %v1725_v50 = vpop.xlane.xlu1 %1724 }
 0x6e9   : > { %2632 = vrcp.f32 %v1725_v50 }
 0x6ef   : > { %v2633_v51 = vpop.eup %2632 }
 0x6f0   : > { %v1728_v53 = vpop.xlane.xlu1 %1727  ;;  %v1739_v54 = vmul.f32 %v2633_v51, %v2625_v6 }
 0x6f1   : > { %2634 = vrcp.f32 %v1728_v53 }
 0x6f2   : > { %v1755_v55 = vpack.c.bf16 %v1739_v54, %v1739_v54  ;;  %v1743_v12 = vsel %vm1698_vm3, %v1739_v54, 0.0 }
 0x6f4   : > { %v1763_v56 = vsel %vm1698_vm3, %v1755_v55, 0  ;;  %v2529_v55 = vld [vmem:[%s3377_s12] sm:$0xff] }
 0x6f5   : > { %1772 = vmatpush.bf16.xpose.msrb.mxu3 %v1763_v56  ;;  %v2530_v56 = vld [vmem:[%s3377_s12 + $0x8] sm:$0xff] }
 0x6f7   : > { %v2635_v58 = vpop.eup %2634 }
 0x6f8   : > { %v1731_v59 = vpop.xlane.xlu1 %1730  ;;  %v1740_v60 = vmul.f32 %v2635_v58, %v2627_v31  ;;  %v2532_v58 = vld [vmem:[%s3377_s12 + $0x18] sm:$0xff]  ;;  %s2660_s12 = scalar_lea.hbm %s2659_s11, 8 }
 0x6f9   : > { %2636 = vrcp.f32 %v1731_v59  ;;  %p2661_p11 = scmp.ne.s32.totalorder %s2659_s11, %s2660_s12  ;;  %p2666_p1 = scmp.lt.s32.totalorder %s2664_s0, %s2660_s12 }
 0x6fa   : > { %v1756_v63 = vpack.c.bf16 %v1740_v60, %v1740_v60  ;;  %v1744_v9 = vsel %vm1698_vm3, %v1740_v60, 0.0 }
 0x6fb   : > { %v1745_v15 = vadd.f32 %v1744_v9, %v1743_v12  ;;  %p2662_p12 = pnand %p2661_p11, %p2885_p5  ;;  %p2667_p2 = por %p2666_p1, %p2665_p0 }
 0x6fc   : > { %2460 = vmatmul.msk.bf16.vlgmr.msrb.gmra.mxu3 %vm1698_vm3, %v1751_v62  ;;  %v1782_v0 = vsel %vm1698_vm3, %v1756_v63, 0 }
 0x6fd   : > { %1791 = vmatpush.bf16.xpose.msra.mxu3 %v1782_v0  ;;  %p2663_p13 = pneg %p2662_p12 }
 0x6ff   : > { %v2637_v1 = vpop.eup %2636  ;;  %p2668_p3 = pnand %p2667_p2, %p2663_p13 }
 0x700   : > { %v1734_v2 = vpop.xlane.xlu1 %1733  ;;  %v1741_v3 = vmul.f32 %v2637_v1, %v2629_v37  ;;  %v1945_v1 = vpop.permute.xlu0 %1944 }
 0x701   : > { %2638 = vrcp.f32 %v1734_v2 }
 0x702   : > { %v1757_v4 = vpack.c.bf16 %v1741_v3, %v1741_v3  ;;  %v1746_v13 = vsel %vm1698_vm3, %v1741_v3, 0.0 }
 0x703   : > { %v1747_v17 = vadd.f32 %v1746_v13, %v1745_v15 }
 0x704   : > { %v1801_v10 = vsel %vm1698_vm3, %v1757_v4, 0  ;;  %v1930_v4 = vpop.permute.xlu2 %1929 }
 0x705   : > { %1810 = vmatpush.bf16.xpose.msra.mxu1 %v1801_v10 }
 0x707   : > { %v2639_v14 = vpop.eup %2638 }
 0x708   : > { %v1742_v16 = vmul.f32 %v2639_v14, %v2631_v7  ;;  %v2527_v7 = vld [vmem:[%s3376_s10] sm:$0xff]  ;;  %v1920_v5 = vpop.permute.xlu0 %1919  ;;  %s2200_s10 = scalar_lea.sflag [#allocation3], %s3031_s23 }
 0x70a   : > { %v1758_v19 = vpack.c.bf16 %v1742_v16, %v1742_v16  ;;  %v1748_v20 = vsel %vm1698_vm3, %v1742_v16, 0.0 }
 0x70b   : > { %v1749_v23 = vadd.f32 %v1748_v20, %v1747_v17 }
 0x70c   : > { %2462 = vmatmul.msk.bf16.vlgmr.msra.gmra.mxu1 %vm1698_vm3, %v1753_v18  ;;  %v1820_v24 = vsel %vm1698_vm3, %v1758_v19, 0  ;;  %v1925_v16 = vpop.permute.xlu2 %1924 }
 0x70d   : > { %1829 = vmatpush.bf16.xpose.msrb.mxu2 %v1820_v24  ;;  %v1750_v25 = vmul.f32 0.25, %v1749_v23 }
 0x70f   : > { %1896 = vst.msk [vmem:[%s3195_s3] sm:$0xff] %vm1698_vm3, %v1750_v25 }
 0x710   : > { %v1915_v22 = vpop.permute.xlu0 %1914 }
 0x714   : > { %2463 = vmatmul.msk.bf16.vlgmr.msrb.gmra.mxu2 %vm1698_vm3, %v1754_v27 }
 0x718   : > { %v1413_v6 = vpop.permute.xlu1 %1412 }
 0x719   : > { %v1479_v28 = vadd.f32 %v1478_v61, %v1413_v6 }
 0x71b   : > { %v1752_v29 = vpack.c.bf16 %v1479_v28, %v1479_v28 }
 0x71d   : > { %2461 = vmatmul.msk.bf16.vlgmr.msra.gmra.mxu3 %vm1698_vm3, %v1752_v29 }
 0x720   : > { %v1859_v45 = vpop.permute.xlu1 %1858 }
 0x728   : > { %v1940_v2 = vpop.permute.xlu1 %1939 }
 0x730   : > { %v1935_v9 = vpop.permute.xlu1 %1934 }
 0x738   : > { %v1910_v26 = vpop.permute.xlu1 %1909 }
 0x77f   : > { %v1774_v30 = vpop.f32.mrf.mxu3 }
 0x787   : > { %v1776_v31 = vpop.f32.mrf.mxu3 }
 0x789   : > { %v1812_v32 = vpop.f32.mrf.mxu1 }
 0x791   : > { %v1814_v33 = vpop.f32.mrf.mxu1 }
 0x792   : > { %v2534_v33 = vld [vmem:[%s3325_s14 + $0x8] sm:$0xff] }
 0x797   : > { %v1831_v34 = vpop.f32.mrf.mxu2 }
 0x798   : > { %v1840_v35 = vpack.c.bf16 %v1831_v34, %v1812_v32  ;;  %v2533_v32 = vld [vmem:[%s3325_s14] sm:$0xff] }
 0x79a   : > { %1883 = vmatpush.bf16.msrb.mxu3 %v1840_v35 }
 0x79f   : > { %v1833_v36 = vpop.f32.mrf.mxu2 }
 0x7a0   : > { %v1793_v37 = vpop.f32.mrf.mxu3 }
 0x7a1   : > { %v1839_v38 = vpack.c.bf16 %v1793_v37, %v1774_v30 }
 0x7a3   : > { %1884 = vmatpush.bf16.msrb.mxu3 %v1839_v38 }
 0x7a6   : > { %2472 = vmatmul.msk.bf16.vlgmr.msrb.gmra.mxu3 %vm836_vm0, %v2527_v7 }
 0x7a8   : > { %v1795_v39 = vpop.f32.mrf.mxu3 }
 0x7b6   : > { %2473 = vmatmul.msk.bf16.gmra.mxu3 %vm836_vm0, %v2528_v40 }
 0x829   : > { %v1886_v41 = vpop.f32.mrf.mxu3 }
 0x82a   : > { %v3217_v53 = vadd.f32 %v1886_v41, %v1844_v52 }
 0x831   : > { %v1888_v42 = vpop.f32.mrf.mxu3 }
 0x832   : > { %v3213_v50 = vadd.f32 %v1888_v42, %v1849_v49 }
 0x834   : > { %v1905_v54 = vpack.c.bf16 %v3213_v50, %v3217_v53 }
 0x839   : > { %v1891_v43 = vpop.f32.mrf.mxu3 }
 0x83a   : > { %v3209_v47 = vadd.f32 %v1891_v43, %v1854_v44 }
 0x841   : > { %v1893_v46 = vpop.f32.mrf.mxu3 }
 0x842   : > { %v3211_v48 = vadd.f32 %v1893_v46, %v1859_v45 }
 0x844   : > { %v1906_v51 = vpack.c.bf16 %v3211_v48, %v3209_v47 }
 0x846   : > { %1985 = vmatpush.bf16.msrb.mxu0 %v1906_v51 }
 0x84a   : > { %1986 = vmatpush.bf16.msrb.mxu0 %v1905_v54 }
 0x84d   : > { %2490 = vmatmul.msk.bf16.vlgmr.msrb.gmra.mxu0 %vm836_vm0, %v2529_v55 }
 0x85d   : > { %2491 = vmatmul.msk.bf16.gmra.mxu0 %vm836_vm0, %v2530_v56 }
 0x86d   : > { %2492 = vmatmul.msk.bf16.gmra.mxu0 %vm836_vm0, %v2531_v57 }
 0x87d   : > { %2493 = vmatmul.msk.bf16.gmra.mxu0 %vm836_vm0, %v2532_v58 }
 0x8ca   : > { %v1988_v59 = vpop.f32.mrf.mxu0 }
 0x8cb   : > { %v1989_v27 = vadd.f32 %v1988_v59, %v1910_v26 }
 0x8cd   : > { %v2008_v30 = vmax.f32 %v1989_v27, 0.0 }
 0x8d2   : > { %v1990_v60 = vpop.f32.mrf.mxu0 }
 0x8d3   : > { %v1991_v23 = vadd.f32 %v1990_v60, %v1915_v22 }
 0x8d5   : > { %v2009_v28 = vmax.f32 %v1991_v23, 0.0 }
 0x8d7   : > { %v2020_v31 = vpack.c.bf16 %v2009_v28, %v2008_v30 }
 0x8da   : > { %v1993_v61 = vpop.f32.mrf.mxu0 }
 0x8db   : > { %v1994_v20 = vadd.f32 %v1993_v61, %v1920_v5 }
 0x8dd   : > { %v2010_v6 = vmax.f32 %v1994_v20, 0.0 }
 0x8e2   : > { %v1995_v62 = vpop.f32.mrf.mxu0 }
 0x8e3   : > { %v1996_v17 = vadd.f32 %v1995_v62, %v1925_v16 }
 0x8e5   : > { %v2011_v24 = vmax.f32 %v1996_v17, 0.0 }
 0x8e7   : > { %v2021_v29 = vpack.c.bf16 %v2011_v24, %v2010_v6 }
 0x8ea   : > { %v1998_v63 = vpop.f32.mrf.mxu0 }
 0x8eb   : > { %v1999_v13 = vadd.f32 %v1998_v63, %v1930_v4 }
 0x8ed   : > { %v2012_v21 = vmax.f32 %v1999_v13, 0.0 }
 0x8f2   : > { %v2000_v0 = vpop.f32.mrf.mxu0 }
 0x8f3   : > { %v2001_v11 = vadd.f32 %v2000_v0, %v1935_v9 }
 0x8f5   : > { %v2013_v18 = vmax.f32 %v2001_v11, 0.0 }
 0x8f7   : > { %v2022_v25 = vpack.c.bf16 %v2013_v18, %v2012_v21 }
 0x8fa   : > { %v2003_v3 = vpop.f32.mrf.mxu0 }
 0x8fb   : > { %v2004_v8 = vadd.f32 %v2003_v3, %v1940_v2 }
 0x8fd   : > { %v2014_v14 = vmax.f32 %v2004_v8, 0.0 }
 0x902   : > { %v2005_v10 = vpop.f32.mrf.mxu0 }
 0x903   : > { %v2006_v12 = vadd.f32 %v2005_v10, %v1945_v1 }
 0x905   : > { %v2015_v15 = vmax.f32 %v2006_v12, 0.0 }
 0x907   : > { %v2023_v19 = vpack.c.bf16 %v2015_v15, %v2014_v14 }
 0x909   : > { %2065 = vmatpush.bf16.msrb.mxu1 %v2023_v19 }
 0x90d   : > { %2066 = vmatpush.bf16.msrb.mxu1 %v2022_v25 }
 0x911   : > { %2067 = vmatpush.bf16.msrb.mxu1 %v2021_v29 }
 0x915   : > { %2068 = vmatpush.bf16.msrb.mxu1 %v2020_v31 }
 0x918   : > { %2502 = vmatmul.msk.bf16.vlgmr.msrb.gmra.mxu1 %vm2054_vm4, %v2533_v32 }
 0x928   : > { %2503 = vmatmul.msk.bf16.gmra.mxu1 %vm2054_vm4, %v2534_v33 }
 0x929   : > { %2671 = shalt.err (!%p2668_p3)
}
 0x92a   : > { %2537 = dma.vmem_to_hbm [thread:$0]  (%p2885_p5), %s2221_s7, 128, %s2223_s27, %s2200_s10  }
 0x92b   : > { %s2234_s8 = sshll.u32 %s3195_s3, 4  ;;  %s2236_s1 = sshll.u32 %s2232_s9, 4  ;;  %s2235_s8 = int_to_ptr.vmem [resolvable:$true] %s2234_s8  ;;  %s2237_s1 = int_to_ptr.hbm [resolvable:$true] %s2236_s1 }
 0x92c   : > { %s2205_s25 = scalar_lea.sflag [#allocation5], %s3031_s23  ;;  %s2686_s24 = sshra.s32 %s2237_s1, 4  ;;  %s2687_s24 = int_to_ptr.hbm [resolvable:$true] %s2686_s24 }
 0x92d   : > { %s2688_s6 = scalar_lea.hbm %s2687_s24, 8  ;;  %s2692_s2 = scalar_lea.hbm %s3331_s20, 16 }
 0x92e   : > { %p2689_p4 = scmp.ne.s32.totalorder %s2687_s24, %s2688_s6  ;;  %p2693_p9 = scmp.lt.s32.totalorder %s2687_s24, %s3331_s20 }
 0x92f   : > { %p2694_p10 = scmp.lt.s32.totalorder %s2692_s2, %s2688_s6 }
 0x930   : > { %p2690_p7 = pnand %p2689_p4, %p2885_p5 }
 0x931   : > { %p2695_p11 = por %p2694_p10, %p2693_p9 }
 0x932   : > { %p2691_p8 = pneg %p2690_p7 }
 0x934   : > { %p2696_p12 = pnand %p2695_p11, %p2691_p8 }
 0x936   : > { %2699 = shalt.err (!%p2696_p12)
}
 0x937   : > { %2538 = dma.vmem_to_hbm [thread:$0]  (%p2885_p5), %s2235_s8, 128, %s2237_s1, %s2205_s25   ;;  %v2027_v36 = vpop.permute.xlu2 %2026  ;;  %v2032_v37 = vpop.permute.xlu1 %2031  ;;  %v2741_v40 = vmov 32.0  }
 0x938   : > { %v2037_v7 = vpop.permute.xlu0 %2036  ;;  %2640 = vrcp.f32 %v2741_v40  ;;  %s670_s4 = scalar_lea.vmem %s3329_s18, %s2903_s28 }
 0x93e   : > { %v2641_v46 = vpop.eup %2640 }
 0x93f   : > { %v2042_v51 = vpop.permute.xlu2 %2041  ;;  %v2098_v57 = vmul.f32 32.0, %v2641_v46  ;;  %vm2102_vm5 = vweird.f32 %v2641_v46  ;;  %v2145_v30 = vpop.permute.xlu1 %2144 }
 0x940   : > { %v2150_v31 = vpop.permute.xlu0 %2149 }
 0x995   : > { %v2070_v34 = vpop.f32.mrf.mxu1 }
 0x996   : > { %v2071_v41 = vadd.f32 %v2070_v34, %v2027_v36  ;;  %v2160_v36 = vpop.permute.xlu1 %2159 }
 0x998   : > { %v2080_v44 = vadd.f32 %v2071_v41, %v3217_v53  ;;  %v2099_v53 = vsub.f32 1.0, %v2098_v57 }
 0x99a   : > { %v2084_v54 = vsel %vm1034_vm2, %v2080_v44, 0.0  ;;  %v2100_v62 = vmul.f32 %v2641_v46, %v2099_v53 }
 0x99c   : > { %v2101_v1 = vadd.f32 %v2641_v46, %v2100_v62 }
 0x99d   : > { %v2072_v35 = vpop.f32.mrf.mxu1 }
 0x99e   : > { %v2073_v38 = vadd.f32 %v2072_v35, %v2032_v37  ;;  %v2103_v4 = vsel %vm2102_vm5, %v2641_v46, %v2101_v1  ;;  %v2155_v35 = vpop.permute.xlu2 %2154 }
 0x9a0   : > { %v2081_v43 = vadd.f32 %v2073_v38, %v3213_v50  ;;  %v2169_v38 = vpop.permute.xlu0 %2168 }
 0x9a2   : > { %v2085_v49 = vsel %vm1034_vm2, %v2081_v43, 0.0 }
 0x9a3   : > { %v2086_v58 = vadd.f32 %v2085_v49, %v2084_v54  ;;  %v2179_v54 = vpop.permute.xlu1 %2178 }
 0x9a5   : > { %v2075_v39 = vpop.f32.mrf.mxu1 }
 0x9a6   : > { %v2076_v42 = vadd.f32 %v2075_v39, %v2037_v7 }
 0x9a8   : > { %v2082_v45 = vadd.f32 %v2076_v42, %v3209_v47 }
 0x9aa   : > { %v2087_v55 = vsel %vm1034_vm2, %v2082_v45, 0.0 }
 0x9ab   : > { %v2088_v60 = vadd.f32 %v2087_v55, %v2086_v58  ;;  %v2184_v55 = vpop.permute.xlu0 %2183 }
 0x9ad   : > { %v2077_v52 = vpop.f32.mrf.mxu1 }
 0x9ae   : > { %v2078_v56 = vadd.f32 %v2077_v52, %v2042_v51  ;;  %v2174_v52 = vpop.permute.xlu2 %2173 }
 0x9b0   : > { %v2083_v59 = vadd.f32 %v2078_v56, %v3211_v48 }
 0x9b2   : > { %v2089_v50 = vsel %vm1034_vm2, %v2083_v59, 0.0 }
 0x9b3   : > { %v2090_v61 = vadd.f32 %v2089_v50, %v2088_v60 }
 0x9b5   : > { %v2091_v47 = vrot.slane %v2090_v61, 4 }
 0x9b7   : > { %v2092_v63 = vadd.f32 %v2091_v47, %v2090_v61 }
 0x9b9   : > { %v2093_v0 = vrot.slane %v2092_v63, 2 }
 0x9bb   : > { %v2094_v2 = vadd.f32 %v2093_v0, %v2092_v63 }
 0x9bd   : > { %v2095_v3 = vrot.slane %v2094_v2, 1 }
 0x9bf   : > { %v2096_v5 = vadd.f32 %v2095_v3, %v2094_v2 }
 0x9c1   : > { %v2104_v8 = vmul.f32 %v2103_v4, %v2096_v5 }
 0x9c3   : > { %v2105_v9 = vsub.f32 %v2080_v44, %v2104_v8  ;;  %v2106_v10 = vsub.f32 %v2081_v43, %v2104_v8  ;;  %v2107_v11 = vsub.f32 %v2082_v45, %v2104_v8  ;;  %v2108_v48 = vsub.f32 %v2083_v59, %v2104_v8 }
 0x9c5   : > { %v2109_v12 = vmul.f32 %v2105_v9, %v2105_v9  ;;  %v2110_v13 = vmul.f32 %v2106_v10, %v2106_v10  ;;  %v2111_v14 = vmul.f32 %v2107_v11, %v2107_v11  ;;  %v2112_v15 = vmul.f32 %v2108_v48, %v2108_v48 }
 0x9c7   : > { %v2113_v16 = vsel %vm1034_vm2, %v2109_v12, 0.0  ;;  %v2114_v17 = vsel %vm1034_vm2, %v2110_v13, 0.0  ;;  %v2116_v19 = vsel %vm1034_vm2, %v2111_v14, 0.0  ;;  %v2118_v21 = vsel %vm1034_vm2, %v2112_v15, 0.0 }
 0x9c8   : > { %v2115_v18 = vadd.f32 %v2114_v17, %v2113_v16 }
 0x9ca   : > { %v2117_v20 = vadd.f32 %v2116_v19, %v2115_v18 }
 0x9cc   : > { %v2119_v22 = vadd.f32 %v2118_v21, %v2117_v20 }
 0x9ce   : > { %v2120_v23 = vrot.slane %v2119_v22, 4 }
 0x9d0   : > { %v2121_v24 = vadd.f32 %v2120_v23, %v2119_v22 }
 0x9d2   : > { %v2122_v25 = vrot.slane %v2121_v24, 2 }
 0x9d4   : > { %v2123_v26 = vadd.f32 %v2122_v25, %v2121_v24 }
 0x9d6   : > { %v2124_v27 = vrot.slane %v2123_v26, 1 }
 0x9d8   : > { %v2125_v6 = vadd.f32 %v2124_v27, %v2123_v26 }
 0x9da   : > { %v2126_v28 = vmul.f32 %v2125_v6, %v2103_v4 }
 0x9dc   : > { %v2127_v29 = vadd.f32 1e-06, %v2126_v28 }
 0x9de   : > { %2642 = vrsqrt.f32 %v2127_v29  ;;  %vm2134_vm7 = vweird.f32 %v2127_v29 }
 0x9e4   : > { %v2643_v32 = vpop.eup %2642 }
 0x9e5   : > { %v2129_v33 = vmul.f32 %v2643_v32, %v2127_v29  ;;  %vm2135_vm6 = vweird.f32 %v2643_v32 }
 0x9e6   : > { %vm2136_vm8 = vmor %vm2134_vm7, %vm2135_vm6 }
 0x9e7   : > { %v2130_v34 = vmul.f32 %v2643_v32, %v2129_v33 }
 0x9e9   : > { %v2131_v37 = vmul.f32 0.5, %v2130_v34 }
 0x9eb   : > { %v2132_v7 = vsub.f32 1.5, %v2131_v37 }
 0x9ed   : > { %v2133_v39 = vmul.f32 %v2643_v32, %v2132_v7 }
 0x9ef   : > { %v2137_v40 = vsel %vm2136_vm8, %v2643_v32, %v2133_v39 }
 0x9f0   : > { %v2138_v41 = vmul.f32 %v2137_v40, %v2105_v9  ;;  %v2139_v42 = vmul.f32 %v2137_v40, %v2106_v10  ;;  %v2140_v43 = vmul.f32 %v2137_v40, %v2107_v11  ;;  %v2141_v44 = vmul.f32 %v2137_v40, %v2108_v48 }
 0x9f2   : > { %v2162_v45 = vmul.f32 %v2145_v30, %v2138_v41  ;;  %v2163_v46 = vmul.f32 %v2150_v31, %v2139_v42  ;;  %v2164_v49 = vmul.f32 %v2155_v35, %v2140_v43  ;;  %v2165_v51 = vmul.f32 %v2160_v36, %v2141_v44 }
 0x9f4   : > { %v2186_v56 = vadd.f32 %v2169_v38, %v2162_v45  ;;  %v2187_v57 = vadd.f32 %v2174_v52, %v2163_v46  ;;  %v2188_v58 = vadd.f32 %v2179_v54, %v2164_v49  ;;  %v2189_v59 = vadd.f32 %v2184_v55, %v2165_v51 }
 0x9f6   : > { %2190 = vst.msk [vmem:[%s670_s4] sm:$0xff] %vm1034_vm2, %v2186_v56 }
 0x9f7   : > { %2191 = vst.msk [vmem:[%s670_s4 + $0x8] sm:$0xff] %vm1034_vm2, %v2187_v57 }
 0x9f8   : > { %2192 = vst.msk [vmem:[%s670_s4 + $0x10] sm:$0xff] %vm1034_vm2, %v2188_v58 }
 0x9f9   : > { %2193 = vst.msk [vmem:[%s670_s4 + $0x18] sm:$0xff] %vm1034_vm2, %v2189_v59 }
 0x9fa PF: > { %s3378_s23 = sld [smem:[#allocation10_spill]] }
 0x9fb   : > { %s3379_s3 = sld [smem:[#allocation8_spill]] }
 0xa00   : > { %p2548_p5 = scmp.ge.s32.totalorder %s3378_s23, 2 }
 0xa01   : > { %s2256_s28 = sand.u32 1, %s3379_s3  }
 0xa02   : > { %p2542_p13 = pnand %p2548_p5, %p2889_p6  ;;  %s2257_s27 = scalar_lea.sflag [#allocation3], %s2256_s28 }
 0xa04   : > { %p2543_p0 = pneg %p2542_p13 }
 0xa06   : > { %2717 = dma.done.wait (%p2543_p0), %s2257_s27, 128  }
 0xa07   : > { %2719 = vsyncadd (%p2543_p0), %s2257_s27, 4294967168  ;;  %s2267_s5 = scalar_lea.sflag [#allocation5], %s2256_s28 }
 0xa08   : > { %2721 = dma.done.wait (%p2543_p0), %s2267_s5, 128  }
 0xa09   : > { %2723 = vsyncadd (%p2543_p0), %s2267_s5, 4294967168  ;;  %s3381_s24 = sld [smem:[#allocation11_spill]]  ;;  %s3384_s1 = smov %s2730_s22 }
 0xa0a   : > { %s3382_s26 = sld [smem:[#allocation9_spill]] }
 0xa0b   : > { %s3383_s23 = sld [smem:[#allocation12_spill]] }
 0xa0f   : > { %p34_p1 = scmp.ge.s32.totalorder %s3381_s24, 4  }
 0xa10   : > { %s3385_s22 = smov %s3382_s26 }
 0xa11   :  { %36 = sbr.rel (!%p34_p1) target bundleno = 19 (0x13), region = 159 }
 0xa16   :  { %2273 = vsyncpa [#allocation3], 1 }
 0xa17   :  { %2275 = vsyncpa [#allocation3 + $0x1], 1 }
 0xa18   :  { %2276 = vsyncpa [#allocation5], 1 }
 0xa19   :  { %2278 = vsyncpa [#allocation5 + $0x1], 1 }

</bundles_post_ra>
